<compile_context>
chip_gen: v7x
topology: tpu7x:2x2x1
jax: 0.10.0
libtpu: 0.0.40
codegen_flags: <defaults>
</compile_context>

<pallas_src>
import functools

import jax
import jax.numpy as jnp
from jax.experimental import pallas as pl
from jax.experimental.pallas import tpu as pltpu


# -----------------------------------------------------------------------------
# Tiling helper
# -----------------------------------------------------------------------------
def _lane_tile(hw, cap=2048):
    """Pick a lane-dense pixel tile (multiple of 128) for the H*W axis."""
    if hw <= cap or hw % 128 != 0:
        return hw  # full-extent block (always legal); typical grids are /128
    for t in (cap, 1024, 512, 256, 128):
        if hw % t == 0:
            return t
    return hw


# -----------------------------------------------------------------------------
# Pallas kernels
# -----------------------------------------------------------------------------
def _pw_conv_add_kernel(x_ref, w_ref, b_ref, add_ref, o_ref):
    """o[n] = w @ x[n] + b + add[n]   (1x1 conv in (C, pixels) layout, fused add)."""
    o_ref[0] = (
        jnp.dot(w_ref[...], x_ref[0], preferred_element_type=jnp.float32)
        + b_ref[...]
        + add_ref[0]
    )


def _pw_conv_shortcut_kernel(g_ref, x_ref, w2_ref, wsc_ref, b_ref, f2_ref, o_ref):
    """Fused residual epilogue: o[n] = w2 @ g[n] + wsc @ x[n] + b + f2[n]."""
    acc = jnp.dot(w2_ref[...], g_ref[0], preferred_element_type=jnp.float32)
    acc = acc + jnp.dot(wsc_ref[...], x_ref[0], preferred_element_type=jnp.float32)
    o_ref[0] = acc + b_ref[...] + f2_ref[0]


def _spectral_mix_kernel(xr_ref, xi_ref, wr_ref, wi_ref, or_ref, oi_ref):
    """Complex channel mixing for ALL Fourier modes of one batch element.

    xr/xi: (1, Cin, M)   real/imag Fourier coeffs, modes on lanes
    wr/wi: (Cout, Cin, M)
    out  : (1, Cout, M)  = sum_i x[:, i, m] * w[o, i, m]  (complex, per mode m)
    Uses the 3-multiply (Karatsuba) complex product.
    """
    cout = wr_ref.shape[0]
    xr = xr_ref[0]                      # (Cin, M)
    xi = xi_ref[0]
    xs = xr + xi
    re_rows = []
    im_rows = []
    for o in range(cout):               # static, tiny
        wr_o = wr_ref[o]                # (Cin, M)
        wi_o = wi_ref[o]
        t1 = jnp.sum(xr * wr_o, axis=0, keepdims=True)           # (1, M)
        t2 = jnp.sum(xi * wi_o, axis=0, keepdims=True)
        t3 = jnp.sum(xs * (wr_o + wi_o), axis=0, keepdims=True)
        re_rows.append(t1 - t2)
        im_rows.append(t3 - t1 - t2)
    or_ref[0] = jnp.concatenate(re_rows, axis=0)                  # (Cout, M)
    oi_ref[0] = jnp.concatenate(im_rows, axis=0)


# -----------------------------------------------------------------------------
# Pallas wrappers
# -----------------------------------------------------------------------------
def pw_conv_add(x, w, b, add):
    """1x1 conv + additive branch.  x: (N, Cin, HW); w: (Cout, Cin); b: (Cout,);
    add: (N, Cout, HW).  Returns (N, Cout, HW)."""
    N, Cin, HW = x.shape
    Cout = w.shape[0]
    t = _lane_tile(HW)
    grid = (N, HW // t)
    return pl.pallas_call(
        _pw_conv_add_kernel,
        out_shape=jax.ShapeDtypeStruct((N, Cout, HW), jnp.float32),
        grid=grid,
        in_specs=[
            pl.BlockSpec((1, Cin, t), lambda n, j: (n, 0, j)),
            pl.BlockSpec((Cout, Cin), lambda n, j: (0, 0)),
            pl.BlockSpec((Cout, 1), lambda n, j: (0, 0)),
            pl.BlockSpec((1, Cout, t), lambda n, j: (n, 0, j)),
        ],
        out_specs=pl.BlockSpec((1, Cout, t), lambda n, j: (n, 0, j)),
        compiler_params=pltpu.CompilerParams(
            dimension_semantics=("parallel", "parallel")),
    )(x, w, b.reshape(Cout, 1), add)


def pw_conv_shortcut(g, x, w2, b2, wsc, bsc, f2):
    """Fused epilogue: conv2(g) + shortcut(x) + f2.
    g: (N, Cout, HW); x: (N, Cin, HW); f2: (N, Cout, HW)."""
    N, Cout, HW = g.shape
    Cin = x.shape[1]
    t = _lane_tile(HW)
    grid = (N, HW // t)
    b = (b2 + bsc).reshape(Cout, 1)
    return pl.pallas_call(
        _pw_conv_shortcut_kernel,
        out_shape=jax.ShapeDtypeStruct((N, Cout, HW), jnp.float32),
        grid=grid,
        in_specs=[
            pl.BlockSpec((1, Cout, t), lambda n, j: (n, 0, j)),
            pl.BlockSpec((1, Cin, t), lambda n, j: (n, 0, j)),
            pl.BlockSpec((Cout, Cout), lambda n, j: (0, 0)),
            pl.BlockSpec((Cout, Cin), lambda n, j: (0, 0)),
            pl.BlockSpec((Cout, 1), lambda n, j: (0, 0)),
            pl.BlockSpec((1, Cout, t), lambda n, j: (n, 0, j)),
        ],
        out_specs=pl.BlockSpec((1, Cout, t), lambda n, j: (n, 0, j)),
        compiler_params=pltpu.CompilerParams(
            dimension_semantics=("parallel", "parallel")),
    )(g, x, w2, wsc, b, f2)


def spectral_mix(xr, xi, wr, wi):
    """xr/xi: (B, Cin, M) Fourier coeffs (both corners stacked along M);
    wr/wi: (Cout, Cin, M).  Returns (re, im) of shape (B, Cout, M)."""
    B, Cin, M = xr.shape
    Cout = wr.shape[0]
    out_shape = (
        jax.ShapeDtypeStruct((B, Cout, M), jnp.float32),
        jax.ShapeDtypeStruct((B, Cout, M), jnp.float32),
    )
    return pl.pallas_call(
        _spectral_mix_kernel,
        out_shape=out_shape,
        grid=(B,),
        in_specs=[
            pl.BlockSpec((1, Cin, M), lambda b: (b, 0, 0)),
            pl.BlockSpec((1, Cin, M), lambda b: (b, 0, 0)),
            pl.BlockSpec((Cout, Cin, M), lambda b: (0, 0, 0)),
            pl.BlockSpec((Cout, Cin, M), lambda b: (0, 0, 0)),
        ],
        out_specs=(
            pl.BlockSpec((1, Cout, M), lambda b: (b, 0, 0)),
            pl.BlockSpec((1, Cout, M), lambda b: (b, 0, 0)),
        ),
        compiler_params=pltpu.CompilerParams(dimension_semantics=("parallel",)),
    )(xr, xi, wr, wi)


# -----------------------------------------------------------------------------
# SpectralConv2d (FFT glue in JAX, mode mixing in Pallas — one call, both corners)
# -----------------------------------------------------------------------------
def spectral_conv2d(x, wr, wi, modes1, modes2):
    """x: (B, Cin, H, W) float32.  wr/wi: (Cout, Cin, 2*m1*m2), pre-packed as
    [weights1 modes | weights2 modes] along the last axis."""
    B, Cin, H, W = x.shape
    Cout = wr.shape[0]
    Wr = W // 2 + 1
    m12 = modes1 * modes2

    x_ft = jnp.fft.rfft2(x)                                     # (B, Cin, H, Wr) c64
    top = x_ft[:, :, :modes1, :modes2].reshape(B, Cin, m12)
    bot = x_ft[:, :, H - modes1:, :modes2].reshape(B, Cin, m12)
    xc = jnp.concatenate([top, bot], axis=-1)                   # (B, Cin, 2*m12)

    ore, oim = spectral_mix(jnp.real(xc), jnp.imag(xc), wr, wi)  # (B, Cout, 2*m12)
    oc = jax.lax.complex(ore, oim)

    out_ft = jnp.zeros((B, Cout, H, Wr), dtype=jnp.complex64)
    out_ft = out_ft.at[:, :, :modes1, :modes2].set(
        oc[:, :, :m12].reshape(B, Cout, modes1, modes2))
    out_ft = out_ft.at[:, :, H - modes1:, :modes2].set(
        oc[:, :, m12:].reshape(B, Cout, modes1, modes2))
    return jnp.fft.irfft2(out_ft, s=(H, W))


# -----------------------------------------------------------------------------
# FourierResidualBlock forward (norm=False -> Identity norms, activation='gelu')
# -----------------------------------------------------------------------------
def fourier_residual_block_forward(x, params, modes1, modes2):
    """x: (N, in_channels, H, W) float32 (NCHW)."""
    N, Cin, H, W = x.shape
    Cout = params["conv1_w"].shape[0]
    HW = H * W

    # norm1 = Identity; exact (erf-based) GELU like torch nn.GELU() default.
    h = jax.nn.gelu(x, approximate=False)

    # out = fourier1(h) + conv1(h)   (conv + spectral-branch add fused in Pallas)
    f1 = spectral_conv2d(h, params["f1_wr"], params["f1_wi"], modes1, modes2)
    out = pw_conv_add(h.reshape(N, Cin, HW), params["conv1_w"], params["conv1_b"],
                      f1.reshape(N, Cout, HW))                  # (N, Cout, HW)

    # norm2 = Identity; activation (elementwise, stays in channel-major layout)
    g = jax.nn.gelu(out, approximate=False)

    # final = fourier2(g) + conv2(g) + shortcut(x)   (fully fused epilogue kernel)
    f2 = spectral_conv2d(g.reshape(N, Cout, H, W), params["f2_wr"], params["f2_wi"],
                         modes1, modes2)
    if "sc_w" in params:
        sc_w, sc_b = params["sc_w"], params["sc_b"]
    else:  # shortcut = nn.Identity() when in_channels == out_channels
        sc_w = jnp.eye(Cout, dtype=jnp.float32)
        sc_b = jnp.zeros((Cout,), jnp.float32)
    final = pw_conv_shortcut(g, x.reshape(N, Cin, HW),
                             params["conv2_w"], params["conv2_b"],
                             sc_w, sc_b, f2.reshape(N, Cout, HW))
    return final.reshape(N, Cout, H, W)


# -----------------------------------------------------------------------------
# Deterministic parameter construction (mirrors the PyTorch __init__)
# -----------------------------------------------------------------------------
def init_params(key, in_ch, out_ch, modes1, modes2):
    ks = jax.random.split(key, 10)
    p = {}
    m12 = modes1 * modes2

    def pack(w):  # torch layout (Cin, Cout, m1, m2, 2) -> (Cout, Cin, m1*m2) re/im
        cin, cout = w.shape[0], w.shape[1]
        wt = jnp.transpose(w, (1, 0, 2, 3, 4)).reshape(cout, cin, m12, 2)
        return wt[..., 0], wt[..., 1]

    def spectral_init(k1, k2, cin, cout):
        scale = 1.0 / (cin * cout)
        w1 = scale * jax.random.uniform(k1, (cin, cout, modes1, modes2, 2), jnp.float32)
        w2 = scale * jax.random.uniform(k2, (cin, cout, modes1, modes2, 2), jnp.float32)
        w1r, w1i = pack(w1)
        w2r, w2i = pack(w2)
        return (jnp.concatenate([w1r, w2r], axis=-1),
                jnp.concatenate([w1i, w2i], axis=-1))

    p["f1_wr"], p["f1_wi"] = spectral_init(ks[0], ks[1], in_ch, out_ch)
    p["f2_wr"], p["f2_wi"] = spectral_init(ks[2], ks[3], out_ch, out_ch)

    # 1x1 convs stored as (Cout, Cin) == torch_weight[:, :, 0, 0]
    def conv_init(kw, kb, cin, cout):
        bound = 1.0 / float(cin) ** 0.5
        w = jax.random.uniform(kw, (cout, cin), jnp.float32, -bound, bound)
        b = jax.random.uniform(kb, (cout,), jnp.float32, -bound, bound)
        return w, b

    p["conv1_w"], p["conv1_b"] = conv_init(ks[4], ks[5], in_ch, out_ch)
    p["conv2_w"], p["conv2_b"] = conv_init(ks[6], ks[7], out_ch, out_ch)
    if in_ch != out_ch:  # shortcut = Conv2d(in_ch, out_ch, 1)
        p["sc_w"], p["sc_b"] = conv_init(ks[8], ks[9], in_ch, out_ch)
    return p


# -----------------------------------------------------------------------------
# Pure-JAX reference (same math, einsum-based) for a sanity cross-check
# -----------------------------------------------------------------------------
def _reference_forward(x, params, modes1, modes2):
    def spectral_ref(v, wr, wi, m1, m2):
        B, Ci, H, W = v.shape
        Co = wr.shape[0]
        w = jax.lax.complex(wr, wi).reshape(Co, Ci, 2, m1, m2)
        vf = jnp.fft.rfft2(v)
        out = jnp.zeros((B, Co, H, W // 2 + 1), jnp.complex64)
        out = out.at[:, :, :m1, :m2].set(
            jnp.einsum("bixy,oixy->boxy", vf[:, :, :m1, :m2], w[:, :, 0]))
        out = out.at[:, :, H - m1:, :m2].set(
            jnp.einsum("bixy,oixy->boxy", vf[:, :, H - m1:, :m2], w[:, :, 1]))
        return jnp.fft.irfft2(out, s=(H, W))

    def conv1x1(v, w, b):
        return jnp.einsum("oi,nihw->nohw", w, v) + b[None, :, None, None]

    h = jax.nn.gelu(x, approximate=False)
    out = (spectral_ref(h, params["f1_wr"], params["f1_wi"], modes1, modes2)
           + conv1x1(h, params["conv1_w"], params["conv1_b"]))
    out = jax.nn.gelu(out, approximate=False)
    sc = (conv1x1(x, params["sc_w"], params["sc_b"]) if "sc_w" in params else x)
    return (spectral_ref(out, params["f2_wr"], params["f2_wi"], modes1, modes2)
            + conv1x1(out, params["conv2_w"], params["conv2_b"]) + sc)


if __name__ == "__main__":
    # FourierResidualBlock(in_channels=8, out_channels=4, modes1=4, modes2=4,
    #                      activation='gelu', norm=False)  -> shortcut conv exercised.
    in_channels, out_channels = 8, 4
    modes1 = modes2 = 4
    N, H, W = 2, 16, 16

    key = jax.random.PRNGKey(0)
    k_x, k_p = jax.random.split(key)
    x = jax.random.normal(k_x, (N, in_channels, H, W), jnp.float32)
    params = init_params(k_p, in_channels, out_channels, modes1, modes2)

    fwd = jax.jit(functools.partial(fourier_residual_block_forward,
                                    modes1=modes1, modes2=modes2))
    out = jax.block_until_ready(fwd(x, params))
    assert out.shape == (N, out_channels, H, W)
    assert out.dtype == jnp.float32

    # Sanity check vs. pure-JAX reference (loose tol: MXU default bf16-pass precision).
    ref = jax.block_until_ready(_reference_forward(x, params, modes1, modes2))
    rel_err = float(jnp.max(jnp.abs(out - ref)) / (jnp.max(jnp.abs(ref)) + 1e-6))
    assert rel_err < 3e-2, f"relative max error too large: {rel_err}"

    print("KERNEL_OK")
</pallas_src>

<mosaic_0001>
module attributes {stable_mosaic.version = 11 : i64} {
  func.func @_spectral_mix_kernel(%arg0: i32, %arg1: memref<1x8x32xf32, #tpu.memory_space<vmem>>, %arg2: memref<1x8x32xf32, #tpu.memory_space<vmem>>, %arg3: memref<4x8x32xf32, #tpu.memory_space<vmem>>, %arg4: memref<4x8x32xf32, #tpu.memory_space<vmem>>, %arg5: memref<1x4x32xf32, #tpu.memory_space<vmem>>, %arg6: memref<1x4x32xf32, #tpu.memory_space<vmem>>) attributes {dimension_semantics = [#tpu.dimension_semantics<parallel>], iteration_bounds = array<i64: 2>, scalar_prefetch = 0 : i64, scratch_operands = 0 : i64, tpu.core_type = #tpu.core_type<tc>, window_params = [{transform_indices = @transform_0, window_bounds = array<i64: 1, 8, 32>}, {transform_indices = @transform_1, window_bounds = array<i64: 1, 8, 32>}, {pipeline_mode = #tpu.pipeline_mode<synchronous>, transform_indices = @transform_2, window_bounds = array<i64: 4, 8, 32>}, {pipeline_mode = #tpu.pipeline_mode<synchronous>, transform_indices = @transform_3, window_bounds = array<i64: 4, 8, 32>}, {transform_indices = @transform_4, window_bounds = array<i64: 1, 4, 32>}, {transform_indices = @transform_5, window_bounds = array<i64: 1, 4, 32>}]} {
    %c0 = arith.constant 0 : index
    %c0_0 = arith.constant 0 : index
    %c0_1 = arith.constant 0 : index
    %0 = vector.load %arg1[%c0, %c0_0, %c0_1] : memref<1x8x32xf32, #tpu.memory_space<vmem>>, vector<1x8x32xf32>
    %1 = vector.shape_cast %0 : vector<1x8x32xf32> to vector<8x32xf32>
    %c0_2 = arith.constant 0 : index
    %c0_3 = arith.constant 0 : index
    %c0_4 = arith.constant 0 : index
    %2 = vector.load %arg2[%c0_2, %c0_3, %c0_4] : memref<1x8x32xf32, #tpu.memory_space<vmem>>, vector<1x8x32xf32>
    %3 = vector.shape_cast %2 : vector<1x8x32xf32> to vector<8x32xf32>
    %4 = arith.addf %1, %3 : vector<8x32xf32>
    %c0_5 = arith.constant 0 : index
    %c0_6 = arith.constant 0 : index
    %c0_7 = arith.constant 0 : index
    %5 = vector.load %arg3[%c0_5, %c0_6, %c0_7] : memref<4x8x32xf32, #tpu.memory_space<vmem>>, vector<1x8x32xf32>
    %6 = vector.shape_cast %5 : vector<1x8x32xf32> to vector<8x32xf32>
    %c0_8 = arith.constant 0 : index
    %c0_9 = arith.constant 0 : index
    %c0_10 = arith.constant 0 : index
    %7 = vector.load %arg4[%c0_8, %c0_9, %c0_10] : memref<4x8x32xf32, #tpu.memory_space<vmem>>, vector<1x8x32xf32>
    %8 = vector.shape_cast %7 : vector<1x8x32xf32> to vector<8x32xf32>
    %9 = arith.mulf %1, %6 : vector<8x32xf32>
    %cst = arith.constant dense<0.000000e+00> : vector<32xf32>
    %10 = vector.multi_reduction <add>, %9, %cst [0] : vector<8x32xf32> to vector<32xf32>
    %11 = vector.shape_cast %10 : vector<32xf32> to vector<1x32xf32>
    %12 = arith.mulf %3, %8 : vector<8x32xf32>
    %cst_11 = arith.constant dense<0.000000e+00> : vector<32xf32>
    %13 = vector.multi_reduction <add>, %12, %cst_11 [0] : vector<8x32xf32> to vector<32xf32>
    %14 = vector.shape_cast %13 : vector<32xf32> to vector<1x32xf32>
    %15 = arith.addf %6, %8 : vector<8x32xf32>
    %16 = arith.mulf %4, %15 : vector<8x32xf32>
    %cst_12 = arith.constant dense<0.000000e+00> : vector<32xf32>
    %17 = vector.multi_reduction <add>, %16, %cst_12 [0] : vector<8x32xf32> to vector<32xf32>
    %18 = vector.shape_cast %17 : vector<32xf32> to vector<1x32xf32>
    %19 = arith.subf %11, %14 : vector<1x32xf32>
    %20 = arith.subf %18, %11 : vector<1x32xf32>
    %21 = arith.subf %20, %14 : vector<1x32xf32>
    %c1 = arith.constant 1 : index
    %c0_13 = arith.constant 0 : index
    %c0_14 = arith.constant 0 : index
    %22 = vector.load %arg3[%c1, %c0_13, %c0_14] : memref<4x8x32xf32, #tpu.memory_space<vmem>>, vector<1x8x32xf32>
    %23 = vector.shape_cast %22 : vector<1x8x32xf32> to vector<8x32xf32>
    %c1_15 = arith.constant 1 : index
    %c0_16 = arith.constant 0 : index
    %c0_17 = arith.constant 0 : index
    %24 = vector.load %arg4[%c1_15, %c0_16, %c0_17] : memref<4x8x32xf32, #tpu.memory_space<vmem>>, vector<1x8x32xf32>
    %25 = vector.shape_cast %24 : vector<1x8x32xf32> to vector<8x32xf32>
    %26 = arith.mulf %1, %23 : vector<8x32xf32>
    %cst_18 = arith.constant dense<0.000000e+00> : vector<32xf32>
    %27 = vector.multi_reduction <add>, %26, %cst_18 [0] : vector<8x32xf32> to vector<32xf32>
    %28 = vector.shape_cast %27 : vector<32xf32> to vector<1x32xf32>
    %29 = arith.mulf %3, %25 : vector<8x32xf32>
    %cst_19 = arith.constant dense<0.000000e+00> : vector<32xf32>
    %30 = vector.multi_reduction <add>, %29, %cst_19 [0] : vector<8x32xf32> to vector<32xf32>
    %31 = vector.shape_cast %30 : vector<32xf32> to vector<1x32xf32>
    %32 = arith.addf %23, %25 : vector<8x32xf32>
    %33 = arith.mulf %4, %32 : vector<8x32xf32>
    %cst_20 = arith.constant dense<0.000000e+00> : vector<32xf32>
    %34 = vector.multi_reduction <add>, %33, %cst_20 [0] : vector<8x32xf32> to vector<32xf32>
    %35 = vector.shape_cast %34 : vector<32xf32> to vector<1x32xf32>
    %36 = arith.subf %28, %31 : vector<1x32xf32>
    %37 = arith.subf %35, %28 : vector<1x32xf32>
    %38 = arith.subf %37, %31 : vector<1x32xf32>
    %c2 = arith.constant 2 : index
    %c0_21 = arith.constant 0 : index
    %c0_22 = arith.constant 0 : index
    %39 = vector.load %arg3[%c2, %c0_21, %c0_22] : memref<4x8x32xf32, #tpu.memory_space<vmem>>, vector<1x8x32xf32>
    %40 = vector.shape_cast %39 : vector<1x8x32xf32> to vector<8x32xf32>
    %c2_23 = arith.constant 2 : index
    %c0_24 = arith.constant 0 : index
    %c0_25 = arith.constant 0 : index
    %41 = vector.load %arg4[%c2_23, %c0_24, %c0_25] : memref<4x8x32xf32, #tpu.memory_space<vmem>>, vector<1x8x32xf32>
    %42 = vector.shape_cast %41 : vector<1x8x32xf32> to vector<8x32xf32>
    %43 = arith.mulf %1, %40 : vector<8x32xf32>
    %cst_26 = arith.constant dense<0.000000e+00> : vector<32xf32>
    %44 = vector.multi_reduction <add>, %43, %cst_26 [0] : vector<8x32xf32> to vector<32xf32>
    %45 = vector.shape_cast %44 : vector<32xf32> to vector<1x32xf32>
    %46 = arith.mulf %3, %42 : vector<8x32xf32>
    %cst_27 = arith.constant dense<0.000000e+00> : vector<32xf32>
    %47 = vector.multi_reduction <add>, %46, %cst_27 [0] : vector<8x32xf32> to vector<32xf32>
    %48 = vector.shape_cast %47 : vector<32xf32> to vector<1x32xf32>
    %49 = arith.addf %40, %42 : vector<8x32xf32>
    %50 = arith.mulf %4, %49 : vector<8x32xf32>
    %cst_28 = arith.constant dense<0.000000e+00> : vector<32xf32>
    %51 = vector.multi_reduction <add>, %50, %cst_28 [0] : vector<8x32xf32> to vector<32xf32>
    %52 = vector.shape_cast %51 : vector<32xf32> to vector<1x32xf32>
    %53 = arith.subf %45, %48 : vector<1x32xf32>
    %54 = arith.subf %52, %45 : vector<1x32xf32>
    %55 = arith.subf %54, %48 : vector<1x32xf32>
    %c3 = arith.constant 3 : index
    %c0_29 = arith.constant 0 : index
    %c0_30 = arith.constant 0 : index
    %56 = vector.load %arg3[%c3, %c0_29, %c0_30] : memref<4x8x32xf32, #tpu.memory_space<vmem>>, vector<1x8x32xf32>
    %57 = vector.shape_cast %56 : vector<1x8x32xf32> to vector<8x32xf32>
    %c3_31 = arith.constant 3 : index
    %c0_32 = arith.constant 0 : index
    %c0_33 = arith.constant 0 : index
    %58 = vector.load %arg4[%c3_31, %c0_32, %c0_33] : memref<4x8x32xf32, #tpu.memory_space<vmem>>, vector<1x8x32xf32>
    %59 = vector.shape_cast %58 : vector<1x8x32xf32> to vector<8x32xf32>
    %60 = arith.mulf %1, %57 : vector<8x32xf32>
    %cst_34 = arith.constant dense<0.000000e+00> : vector<32xf32>
    %61 = vector.multi_reduction <add>, %60, %cst_34 [0] : vector<8x32xf32> to vector<32xf32>
    %62 = vector.shape_cast %61 : vector<32xf32> to vector<1x32xf32>
    %63 = arith.mulf %3, %59 : vector<8x32xf32>
    %cst_35 = arith.constant dense<0.000000e+00> : vector<32xf32>
    %64 = vector.multi_reduction <add>, %63, %cst_35 [0] : vector<8x32xf32> to vector<32xf32>
    %65 = vector.shape_cast %64 : vector<32xf32> to vector<1x32xf32>
    %66 = arith.addf %57, %59 : vector<8x32xf32>
    %67 = arith.mulf %4, %66 : vector<8x32xf32>
    %cst_36 = arith.constant dense<0.000000e+00> : vector<32xf32>
    %68 = vector.multi_reduction <add>, %67, %cst_36 [0] : vector<8x32xf32> to vector<32xf32>
    %69 = vector.shape_cast %68 : vector<32xf32> to vector<1x32xf32>
    %70 = arith.subf %62, %65 : vector<1x32xf32>
    %71 = arith.subf %69, %62 : vector<1x32xf32>
    %72 = arith.subf %71, %65 : vector<1x32xf32>
    %73 = tpu.concatenate %19, %36, %53, %70 in 0 : vector<1x32xf32>, vector<1x32xf32>, vector<1x32xf32>, vector<1x32xf32> -> vector<4x32xf32>
    %c0_37 = arith.constant 0 : index
    %c0_38 = arith.constant 0 : index
    %c0_39 = arith.constant 0 : index
    %74 = vector.load %arg5[%c0_37, %c0_38, %c0_39] : memref<1x4x32xf32, #tpu.memory_space<vmem>>, vector<1x4x32xf32>
    %75 = vector.shape_cast %74 : vector<1x4x32xf32> to vector<4x32xf32>
    %76 = vector.shape_cast %73 : vector<4x32xf32> to vector<1x4x32xf32>
    tpu.vector_store %arg5[%c0_37, %c0_38, %c0_39], %76 {strides = array<i32>} : memref<1x4x32xf32, #tpu.memory_space<vmem>>, vector<1x4x32xf32>,
    %77 = tpu.concatenate %21, %38, %55, %72 in 0 : vector<1x32xf32>, vector<1x32xf32>, vector<1x32xf32>, vector<1x32xf32> -> vector<4x32xf32>
    %c0_40 = arith.constant 0 : index
    %c0_41 = arith.constant 0 : index
    %c0_42 = arith.constant 0 : index
    %78 = vector.load %arg6[%c0_40, %c0_41, %c0_42] : memref<1x4x32xf32, #tpu.memory_space<vmem>>, vector<1x4x32xf32>
    %79 = vector.shape_cast %78 : vector<1x4x32xf32> to vector<4x32xf32>
    %80 = vector.shape_cast %77 : vector<4x32xf32> to vector<1x4x32xf32>
    tpu.vector_store %arg6[%c0_40, %c0_41, %c0_42], %80 {strides = array<i32>} : memref<1x4x32xf32, #tpu.memory_space<vmem>>, vector<1x4x32xf32>,
    return
  }
  func.func @transform_0(%arg0: i32) -> (i32, i32, i32) {
    %c0_i32 = arith.constant 0 : i32
    %c0_i32_0 = arith.constant 0 : i32
    %c0_i32_1 = arith.constant 0 : i32
    return %arg0, %c0_i32, %c0_i32_0 : i32, i32, i32
  }
  func.func @transform_1(%arg0: i32) -> (i32, i32, i32) {
    %c0_i32 = arith.constant 0 : i32
    %c0_i32_0 = arith.constant 0 : i32
    %c0_i32_1 = arith.constant 0 : i32
    return %arg0, %c0_i32, %c0_i32_0 : i32, i32, i32
  }
  func.func @transform_2(%arg0: i32) -> (i32, i32, i32) {
    %c0_i32 = arith.constant 0 : i32
    %c0_i32_0 = arith.constant 0 : i32
    %c0_i32_1 = arith.constant 0 : i32
    %c0_i32_2 = arith.constant 0 : i32
    return %c0_i32, %c0_i32_0, %c0_i32_1 : i32, i32, i32
  }
  func.func @transform_3(%arg0: i32) -> (i32, i32, i32) {
    %c0_i32 = arith.constant 0 : i32
    %c0_i32_0 = arith.constant 0 : i32
    %c0_i32_1 = arith.constant 0 : i32
    %c0_i32_2 = arith.constant 0 : i32
    return %c0_i32, %c0_i32_0, %c0_i32_1 : i32, i32, i32
  }
  func.func @transform_4(%arg0: i32) -> (i32, i32, i32) {
    %c0_i32 = arith.constant 0 : i32
    %c0_i32_0 = arith.constant 0 : i32
    %c0_i32_1 = arith.constant 0 : i32
    return %arg0, %c0_i32, %c0_i32_0 : i32, i32, i32
  }
  func.func @transform_5(%arg0: i32) -> (i32, i32, i32) {
    %c0_i32 = arith.constant 0 : i32
    %c0_i32_0 = arith.constant 0 : i32
    %c0_i32_1 = arith.constant 0 : i32
    return %arg0, %c0_i32, %c0_i32_0 : i32, i32, i32
  }
}

module attributes {stable_mosaic.version = 11 : i64} {
  func.func @_pw_conv_add_kernel(%arg0: i32, %arg1: i32, %arg2: memref<1x8x256xf32, #tpu.memory_space<vmem>>, %arg3: memref<4x8xf32, #tpu.memory_space<vmem>>, %arg4: memref<4x1xf32, #tpu.memory_space<vmem>>, %arg5: memref<1x4x256xf32, #tpu.memory_space<vmem>>, %arg6: memref<1x4x256xf32, #tpu.memory_space<vmem>>) attributes {dimension_semantics = [#tpu.dimension_semantics<parallel>, #tpu.dimension_semantics<parallel>], iteration_bounds = array<i64: 2, 1>, scalar_prefetch = 0 : i64, scratch_operands = 0 : i64, tpu.core_type = #tpu.core_type<tc>, window_params = [{transform_indices = @transform_0, window_bounds = array<i64: 1, 8, 256>}, {pipeline_mode = #tpu.pipeline_mode<synchronous>, transform_indices = @transform_1, window_bounds = array<i64: 4, 8>}, {pipeline_mode = #tpu.pipeline_mode<synchronous>, transform_indices = @transform_2, window_bounds = array<i64: 4, 1>}, {transform_indices = @transform_3, window_bounds = array<i64: 1, 4, 256>}, {transform_indices = @transform_4, window_bounds = array<i64: 1, 4, 256>}]} {
    %c0 = arith.constant 0 : index
    %c0_0 = arith.constant 0 : index
    %0 = vector.load %arg3[%c0, %c0_0] : memref<4x8xf32, #tpu.memory_space<vmem>>, vector<4x8xf32>
    %c0_1 = arith.constant 0 : index
    %c0_2 = arith.constant 0 : index
    %c0_3 = arith.constant 0 : index
    %1 = vector.load %arg2[%c0_1, %c0_2, %c0_3] : memref<1x8x256xf32, #tpu.memory_space<vmem>>, vector<1x8x256xf32>
    %2 = vector.shape_cast %1 : vector<1x8x256xf32> to vector<8x256xf32>
    %cst = arith.constant dense<0.000000e+00> : vector<4x256xf32>
    %3 = tpu.matmul %0, %2, %cst {dimension_numbers = #tpu.dot_dimension_numbers<[1], [0], [0], [1], [0, 0, 1, 1], [], []>} : vector<4x8xf32>, vector<8x256xf32>, vector<4x256xf32> -> vector<4x256xf32>
    %c0_4 = arith.constant 0 : index
    %c0_5 = arith.constant 0 : index
    %4 = vector.load %arg4[%c0_4, %c0_5] : memref<4x1xf32, #tpu.memory_space<vmem>>, vector<4x1xf32>
    %5 = vector.broadcast %4 : vector<4x1xf32> to vector<4x256xf32>
    %6 = arith.addf %3, %5 : vector<4x256xf32>
    %c0_6 = arith.constant 0 : index
    %c0_7 = arith.constant 0 : index
    %c0_8 = arith.constant 0 : index
    %7 = vector.load %arg5[%c0_6, %c0_7, %c0_8] : memref<1x4x256xf32, #tpu.memory_space<vmem>>, vector<1x4x256xf32>
    %8 = vector.shape_cast %7 : vector<1x4x256xf32> to vector<4x256xf32>
    %9 = arith.addf %6, %8 : vector<4x256xf32>
    %c0_9 = arith.constant 0 : index
    %c0_10 = arith.constant 0 : index
    %c0_11 = arith.constant 0 : index
    %10 = vector.load %arg6[%c0_9, %c0_10, %c0_11] : memref<1x4x256xf32, #tpu.memory_space<vmem>>, vector<1x4x256xf32>
    %11 = vector.shape_cast %10 : vector<1x4x256xf32> to vector<4x256xf32>
    %12 = vector.shape_cast %9 : vector<4x256xf32> to vector<1x4x256xf32>
    tpu.vector_store %arg6[%c0_9, %c0_10, %c0_11], %12 {strides = array<i32>} : memref<1x4x256xf32, #tpu.memory_space<vmem>>, vector<1x4x256xf32>,
    return
  }
  func.func @transform_0(%arg0: i32, %arg1: i32) -> (i32, i32, i32) {
    %c0_i32 = arith.constant 0 : i32
    %c0_i32_0 = arith.constant 0 : i32
    return %arg0, %c0_i32, %arg1 : i32, i32, i32
  }
  func.func @transform_1(%arg0: i32, %arg1: i32) -> (i32, i32) {
    %c0_i32 = arith.constant 0 : i32
    %c0_i32_0 = arith.constant 0 : i32
    %c0_i32_1 = arith.constant 0 : i32
    return %c0_i32, %c0_i32_0 : i32, i32
  }
  func.func @transform_2(%arg0: i32, %arg1: i32) -> (i32, i32) {
    %c0_i32 = arith.constant 0 : i32
    %c0_i32_0 = arith.constant 0 : i32
    %c0_i32_1 = arith.constant 0 : i32
    return %c0_i32, %c0_i32_0 : i32, i32
  }
  func.func @transform_3(%arg0: i32, %arg1: i32) -> (i32, i32, i32) {
    %c0_i32 = arith.constant 0 : i32
    %c0_i32_0 = arith.constant 0 : i32
    return %arg0, %c0_i32, %arg1 : i32, i32, i32
  }
  func.func @transform_4(%arg0: i32, %arg1: i32) -> (i32, i32, i32) {
    %c0_i32 = arith.constant 0 : i32
    %c0_i32_0 = arith.constant 0 : i32
    return %arg0, %c0_i32, %arg1 : i32, i32, i32
  }
}

module attributes {stable_mosaic.version = 11 : i64} {
  func.func @_spectral_mix_kernel(%arg0: i32, %arg1: memref<1x4x32xf32, #tpu.memory_space<vmem>>, %arg2: memref<1x4x32xf32, #tpu.memory_space<vmem>>, %arg3: memref<4x4x32xf32, #tpu.memory_space<vmem>>, %arg4: memref<4x4x32xf32, #tpu.memory_space<vmem>>, %arg5: memref<1x4x32xf32, #tpu.memory_space<vmem>>, %arg6: memref<1x4x32xf32, #tpu.memory_space<vmem>>) attributes {dimension_semantics = [#tpu.dimension_semantics<parallel>], iteration_bounds = array<i64: 2>, scalar_prefetch = 0 : i64, scratch_operands = 0 : i64, tpu.core_type = #tpu.core_type<tc>, window_params = [{transform_indices = @transform_0, window_bounds = array<i64: 1, 4, 32>}, {transform_indices = @transform_1, window_bounds = array<i64: 1, 4, 32>}, {pipeline_mode = #tpu.pipeline_mode<synchronous>, transform_indices = @transform_2, window_bounds = array<i64: 4, 4, 32>}, {pipeline_mode = #tpu.pipeline_mode<synchronous>, transform_indices = @transform_3, window_bounds = array<i64: 4, 4, 32>}, {transform_indices = @transform_4, window_bounds = array<i64: 1, 4, 32>}, {transform_indices = @transform_5, window_bounds = array<i64: 1, 4, 32>}]} {
    %c0 = arith.constant 0 : index
    %c0_0 = arith.constant 0 : index
    %c0_1 = arith.constant 0 : index
    %0 = vector.load %arg1[%c0, %c0_0, %c0_1] : memref<1x4x32xf32, #tpu.memory_space<vmem>>, vector<1x4x32xf32>
    %1 = vector.shape_cast %0 : vector<1x4x32xf32> to vector<4x32xf32>
    %c0_2 = arith.constant 0 : index
    %c0_3 = arith.constant 0 : index
    %c0_4 = arith.constant 0 : index
    %2 = vector.load %arg2[%c0_2, %c0_3, %c0_4] : memref<1x4x32xf32, #tpu.memory_space<vmem>>, vector<1x4x32xf32>
    %3 = vector.shape_cast %2 : vector<1x4x32xf32> to vector<4x32xf32>
    %4 = arith.addf %1, %3 : vector<4x32xf32>
    %c0_5 = arith.constant 0 : index
    %c0_6 = arith.constant 0 : index
    %c0_7 = arith.constant 0 : index
    %5 = vector.load %arg3[%c0_5, %c0_6, %c0_7] : memref<4x4x32xf32, #tpu.memory_space<vmem>>, vector<1x4x32xf32>
    %6 = vector.shape_cast %5 : vector<1x4x32xf32> to vector<4x32xf32>
    %c0_8 = arith.constant 0 : index
    %c0_9 = arith.constant 0 : index
    %c0_10 = arith.constant 0 : index
    %7 = vector.load %arg4[%c0_8, %c0_9, %c0_10] : memref<4x4x32xf32, #tpu.memory_space<vmem>>, vector<1x4x32xf32>
    %8 = vector.shape_cast %7 : vector<1x4x32xf32> to vector<4x32xf32>
    %9 = arith.mulf %1, %6 : vector<4x32xf32>
    %cst = arith.constant dense<0.000000e+00> : vector<32xf32>
    %10 = vector.multi_reduction <add>, %9, %cst [0] : vector<4x32xf32> to vector<32xf32>
    %11 = vector.shape_cast %10 : vector<32xf32> to vector<1x32xf32>
    %12 = arith.mulf %3, %8 : vector<4x32xf32>
    %cst_11 = arith.constant dense<0.000000e+00> : vector<32xf32>
    %13 = vector.multi_reduction <add>, %12, %cst_11 [0] : vector<4x32xf32> to vector<32xf32>
    %14 = vector.shape_cast %13 : vector<32xf32> to vector<1x32xf32>
    %15 = arith.addf %6, %8 : vector<4x32xf32>
    %16 = arith.mulf %4, %15 : vector<4x32xf32>
    %cst_12 = arith.constant dense<0.000000e+00> : vector<32xf32>
    %17 = vector.multi_reduction <add>, %16, %cst_12 [0] : vector<4x32xf32> to vector<32xf32>
    %18 = vector.shape_cast %17 : vector<32xf32> to vector<1x32xf32>
    %19 = arith.subf %11, %14 : vector<1x32xf32>
    %20 = arith.subf %18, %11 : vector<1x32xf32>
    %21 = arith.subf %20, %14 : vector<1x32xf32>
    %c1 = arith.constant 1 : index
    %c0_13 = arith.constant 0 : index
    %c0_14 = arith.constant 0 : index
    %22 = vector.load %arg3[%c1, %c0_13, %c0_14] : memref<4x4x32xf32, #tpu.memory_space<vmem>>, vector<1x4x32xf32>
    %23 = vector.shape_cast %22 : vector<1x4x32xf32> to vector<4x32xf32>
    %c1_15 = arith.constant 1 : index
    %c0_16 = arith.constant 0 : index
    %c0_17 = arith.constant 0 : index
    %24 = vector.load %arg4[%c1_15, %c0_16, %c0_17] : memref<4x4x32xf32, #tpu.memory_space<vmem>>, vector<1x4x32xf32>
    %25 = vector.shape_cast %24 : vector<1x4x32xf32> to vector<4x32xf32>
    %26 = arith.mulf %1, %23 : vector<4x32xf32>
    %cst_18 = arith.constant dense<0.000000e+00> : vector<32xf32>
    %27 = vector.multi_reduction <add>, %26, %cst_18 [0] : vector<4x32xf32> to vector<32xf32>
    %28 = vector.shape_cast %27 : vector<32xf32> to vector<1x32xf32>
    %29 = arith.mulf %3, %25 : vector<4x32xf32>
    %cst_19 = arith.constant dense<0.000000e+00> : vector<32xf32>
    %30 = vector.multi_reduction <add>, %29, %cst_19 [0] : vector<4x32xf32> to vector<32xf32>
    %31 = vector.shape_cast %30 : vector<32xf32> to vector<1x32xf32>
    %32 = arith.addf %23, %25 : vector<4x32xf32>
    %33 = arith.mulf %4, %32 : vector<4x32xf32>
    %cst_20 = arith.constant dense<0.000000e+00> : vector<32xf32>
    %34 = vector.multi_reduction <add>, %33, %cst_20 [0] : vector<4x32xf32> to vector<32xf32>
    %35 = vector.shape_cast %34 : vector<32xf32> to vector<1x32xf32>
    %36 = arith.subf %28, %31 : vector<1x32xf32>
    %37 = arith.subf %35, %28 : vector<1x32xf32>
    %38 = arith.subf %37, %31 : vector<1x32xf32>
    %c2 = arith.constant 2 : index
    %c0_21 = arith.constant 0 : index
    %c0_22 = arith.constant 0 : index
    %39 = vector.load %arg3[%c2, %c0_21, %c0_22] : memref<4x4x32xf32, #tpu.memory_space<vmem>>, vector<1x4x32xf32>
    %40 = vector.shape_cast %39 : vector<1x4x32xf32> to vector<4x32xf32>
    %c2_23 = arith.constant 2 : index
    %c0_24 = arith.constant 0 : index
    %c0_25 = arith.constant 0 : index
    %41 = vector.load %arg4[%c2_23, %c0_24, %c0_25] : memref<4x4x32xf32, #tpu.memory_space<vmem>>, vector<1x4x32xf32>
    %42 = vector.shape_cast %41 : vector<1x4x32xf32> to vector<4x32xf32>
    %43 = arith.mulf %1, %40 : vector<4x32xf32>
    %cst_26 = arith.constant dense<0.000000e+00> : vector<32xf32>
    %44 = vector.multi_reduction <add>, %43, %cst_26 [0] : vector<4x32xf32> to vector<32xf32>
    %45 = vector.shape_cast %44 : vector<32xf32> to vector<1x32xf32>
    %46 = arith.mulf %3, %42 : vector<4x32xf32>
    %cst_27 = arith.constant dense<0.000000e+00> : vector<32xf32>
    %47 = vector.multi_reduction <add>, %46, %cst_27 [0] : vector<4x32xf32> to vector<32xf32>
    %48 = vector.shape_cast %47 : vector<32xf32> to vector<1x32xf32>
    %49 = arith.addf %40, %42 : vector<4x32xf32>
    %50 = arith.mulf %4, %49 : vector<4x32xf32>
    %cst_28 = arith.constant dense<0.000000e+00> : vector<32xf32>
    %51 = vector.multi_reduction <add>, %50, %cst_28 [0] : vector<4x32xf32> to vector<32xf32>
    %52 = vector.shape_cast %51 : vector<32xf32> to vector<1x32xf32>
    %53 = arith.subf %45, %48 : vector<1x32xf32>
    %54 = arith.subf %52, %45 : vector<1x32xf32>
    %55 = arith.subf %54, %48 : vector<1x32xf32>
    %c3 = arith.constant 3 : index
    %c0_29 = arith.constant 0 : index
    %c0_30 = arith.constant 0 : index
    %56 = vector.load %arg3[%c3, %c0_29, %c0_30] : memref<4x4x32xf32, #tpu.memory_space<vmem>>, vector<1x4x32xf32>
    %57 = vector.shape_cast %56 : vector<1x4x32xf32> to vector<4x32xf32>
    %c3_31 = arith.constant 3 : index
    %c0_32 = arith.constant 0 : index
    %c0_33 = arith.constant 0 : index
    %58 = vector.load %arg4[%c3_31, %c0_32, %c0_33] : memref<4x4x32xf32, #tpu.memory_space<vmem>>, vector<1x4x32xf32>
    %59 = vector.shape_cast %58 : vector<1x4x32xf32> to vector<4x32xf32>
    %60 = arith.mulf %1, %57 : vector<4x32xf32>
    %cst_34 = arith.constant dense<0.000000e+00> : vector<32xf32>
    %61 = vector.multi_reduction <add>, %60, %cst_34 [0] : vector<4x32xf32> to vector<32xf32>
    %62 = vector.shape_cast %61 : vector<32xf32> to vector<1x32xf32>
    %63 = arith.mulf %3, %59 : vector<4x32xf32>
    %cst_35 = arith.constant dense<0.000000e+00> : vector<32xf32>
    %64 = vector.multi_reduction <add>, %63, %cst_35 [0] : vector<4x32xf32> to vector<32xf32>
    %65 = vector.shape_cast %64 : vector<32xf32> to vector<1x32xf32>
    %66 = arith.addf %57, %59 : vector<4x32xf32>
    %67 = arith.mulf %4, %66 : vector<4x32xf32>
    %cst_36 = arith.constant dense<0.000000e+00> : vector<32xf32>
    %68 = vector.multi_reduction <add>, %67, %cst_36 [0] : vector<4x32xf32> to vector<32xf32>
    %69 = vector.shape_cast %68 : vector<32xf32> to vector<1x32xf32>
    %70 = arith.subf %62, %65 : vector<1x32xf32>
    %71 = arith.subf %69, %62 : vector<1x32xf32>
    %72 = arith.subf %71, %65 : vector<1x32xf32>
    %73 = tpu.concatenate %19, %36, %53, %70 in 0 : vector<1x32xf32>, vector<1x32xf32>, vector<1x32xf32>, vector<1x32xf32> -> vector<4x32xf32>
    %c0_37 = arith.constant 0 : index
    %c0_38 = arith.constant 0 : index
    %c0_39 = arith.constant 0 : index
    %74 = vector.load %arg5[%c0_37, %c0_38, %c0_39] : memref<1x4x32xf32, #tpu.memory_space<vmem>>, vector<1x4x32xf32>
    %75 = vector.shape_cast %74 : vector<1x4x32xf32> to vector<4x32xf32>
    %76 = vector.shape_cast %73 : vector<4x32xf32> to vector<1x4x32xf32>
    tpu.vector_store %arg5[%c0_37, %c0_38, %c0_39], %76 {strides = array<i32>} : memref<1x4x32xf32, #tpu.memory_space<vmem>>, vector<1x4x32xf32>,
    %77 = tpu.concatenate %21, %38, %55, %72 in 0 : vector<1x32xf32>, vector<1x32xf32>, vector<1x32xf32>, vector<1x32xf32> -> vector<4x32xf32>
    %c0_40 = arith.constant 0 : index
    %c0_41 = arith.constant 0 : index
    %c0_42 = arith.constant 0 : index
    %78 = vector.load %arg6[%c0_40, %c0_41, %c0_42] : memref<1x4x32xf32, #tpu.memory_space<vmem>>, vector<1x4x32xf32>
    %79 = vector.shape_cast %78 : vector<1x4x32xf32> to vector<4x32xf32>
    %80 = vector.shape_cast %77 : vector<4x32xf32> to vector<1x4x32xf32>
    tpu.vector_store %arg6[%c0_40, %c0_41, %c0_42], %80 {strides = array<i32>} : memref<1x4x32xf32, #tpu.memory_space<vmem>>, vector<1x4x32xf32>,
    return
  }
  func.func @transform_0(%arg0: i32) -> (i32, i32, i32) {
    %c0_i32 = arith.constant 0 : i32
    %c0_i32_0 = arith.constant 0 : i32
    %c0_i32_1 = arith.constant 0 : i32
    return %arg0, %c0_i32, %c0_i32_0 : i32, i32, i32
  }
  func.func @transform_1(%arg0: i32) -> (i32, i32, i32) {
    %c0_i32 = arith.constant 0 : i32
    %c0_i32_0 = arith.constant 0 : i32
    %c0_i32_1 = arith.constant 0 : i32
    return %arg0, %c0_i32, %c0_i32_0 : i32, i32, i32
  }
  func.func @transform_2(%arg0: i32) -> (i32, i32, i32) {
    %c0_i32 = arith.constant 0 : i32
    %c0_i32_0 = arith.constant 0 : i32
    %c0_i32_1 = arith.constant 0 : i32
    %c0_i32_2 = arith.constant 0 : i32
    return %c0_i32, %c0_i32_0, %c0_i32_1 : i32, i32, i32
  }
  func.func @transform_3(%arg0: i32) -> (i32, i32, i32) {
    %c0_i32 = arith.constant 0 : i32
    %c0_i32_0 = arith.constant 0 : i32
    %c0_i32_1 = arith.constant 0 : i32
    %c0_i32_2 = arith.constant 0 : i32
    return %c0_i32, %c0_i32_0, %c0_i32_1 : i32, i32, i32
  }
  func.func @transform_4(%arg0: i32) -> (i32, i32, i32) {
    %c0_i32 = arith.constant 0 : i32
    %c0_i32_0 = arith.constant 0 : i32
    %c0_i32_1 = arith.constant 0 : i32
    return %arg0, %c0_i32, %c0_i32_0 : i32, i32, i32
  }
  func.func @transform_5(%arg0: i32) -> (i32, i32, i32) {
    %c0_i32 = arith.constant 0 : i32
    %c0_i32_0 = arith.constant 0 : i32
    %c0_i32_1 = arith.constant 0 : i32
    return %arg0, %c0_i32, %c0_i32_0 : i32, i32, i32
  }
}

module attributes {stable_mosaic.version = 11 : i64} {
  func.func @_pw_conv_shortcut_kernel(%arg0: i32, %arg1: i32, %arg2: memref<1x4x256xf32, #tpu.memory_space<vmem>>, %arg3: memref<1x8x256xf32, #tpu.memory_space<vmem>>, %arg4: memref<4x4xf32, #tpu.memory_space<vmem>>, %arg5: memref<4x8xf32, #tpu.memory_space<vmem>>, %arg6: memref<4x1xf32, #tpu.memory_space<vmem>>, %arg7: memref<1x4x256xf32, #tpu.memory_space<vmem>>, %arg8: memref<1x4x256xf32, #tpu.memory_space<vmem>>) attributes {dimension_semantics = [#tpu.dimension_semantics<parallel>, #tpu.dimension_semantics<parallel>], iteration_bounds = array<i64: 2, 1>, scalar_prefetch = 0 : i64, scratch_operands = 0 : i64, tpu.core_type = #tpu.core_type<tc>, window_params = [{transform_indices = @transform_0, window_bounds = array<i64: 1, 4, 256>}, {transform_indices = @transform_1, window_bounds = array<i64: 1, 8, 256>}, {pipeline_mode = #tpu.pipeline_mode<synchronous>, transform_indices = @transform_2, window_bounds = array<i64: 4, 4>}, {pipeline_mode = #tpu.pipeline_mode<synchronous>, transform_indices = @transform_3, window_bounds = array<i64: 4, 8>}, {pipeline_mode = #tpu.pipeline_mode<synchronous>, transform_indices = @transform_4, window_bounds = array<i64: 4, 1>}, {transform_indices = @transform_5, window_bounds = array<i64: 1, 4, 256>}, {transform_indices = @transform_6, window_bounds = array<i64: 1, 4, 256>}]} {
    %c0 = arith.constant 0 : index
    %c0_0 = arith.constant 0 : index
    %0 = vector.load %arg4[%c0, %c0_0] : memref<4x4xf32, #tpu.memory_space<vmem>>, vector<4x4xf32>
    %c0_1 = arith.constant 0 : index
    %c0_2 = arith.constant 0 : index
    %c0_3 = arith.constant 0 : index
    %1 = vector.load %arg2[%c0_1, %c0_2, %c0_3] : memref<1x4x256xf32, #tpu.memory_space<vmem>>, vector<1x4x256xf32>
    %2 = vector.shape_cast %1 : vector<1x4x256xf32> to vector<4x256xf32>
    %cst = arith.constant dense<0.000000e+00> : vector<4x256xf32>
    %3 = tpu.matmul %0, %2, %cst {dimension_numbers = #tpu.dot_dimension_numbers<[1], [0], [0], [1], [0, 0, 1, 1], [], []>} : vector<4x4xf32>, vector<4x256xf32>, vector<4x256xf32> -> vector<4x256xf32>
    %c0_4 = arith.constant 0 : index
    %c0_5 = arith.constant 0 : index
    %4 = vector.load %arg5[%c0_4, %c0_5] : memref<4x8xf32, #tpu.memory_space<vmem>>, vector<4x8xf32>
    %c0_6 = arith.constant 0 : index
    %c0_7 = arith.constant 0 : index
    %c0_8 = arith.constant 0 : index
    %5 = vector.load %arg3[%c0_6, %c0_7, %c0_8] : memref<1x8x256xf32, #tpu.memory_space<vmem>>, vector<1x8x256xf32>
    %6 = vector.shape_cast %5 : vector<1x8x256xf32> to vector<8x256xf32>
    %cst_9 = arith.constant dense<0.000000e+00> : vector<4x256xf32>
    %7 = tpu.matmul %4, %6, %cst_9 {dimension_numbers = #tpu.dot_dimension_numbers<[1], [0], [0], [1], [0, 0, 1, 1], [], []>} : vector<4x8xf32>, vector<8x256xf32>, vector<4x256xf32> -> vector<4x256xf32>
    %8 = arith.addf %3, %7 : vector<4x256xf32>
    %c0_10 = arith.constant 0 : index
    %c0_11 = arith.constant 0 : index
    %9 = vector.load %arg6[%c0_10, %c0_11] : memref<4x1xf32, #tpu.memory_space<vmem>>, vector<4x1xf32>
    %10 = vector.broadcast %9 : vector<4x1xf32> to vector<4x256xf32>
    %11 = arith.addf %8, %10 : vector<4x256xf32>
    %c0_12 = arith.constant 0 : index
    %c0_13 = arith.constant 0 : index
    %c0_14 = arith.constant 0 : index
    %12 = vector.load %arg7[%c0_12, %c0_13, %c0_14] : memref<1x4x256xf32, #tpu.memory_space<vmem>>, vector<1x4x256xf32>
    %13 = vector.shape_cast %12 : vector<1x4x256xf32> to vector<4x256xf32>
    %14 = arith.addf %11, %13 : vector<4x256xf32>
    %c0_15 = arith.constant 0 : index
    %c0_16 = arith.constant 0 : index
    %c0_17 = arith.constant 0 : index
    %15 = vector.load %arg8[%c0_15, %c0_16, %c0_17] : memref<1x4x256xf32, #tpu.memory_space<vmem>>, vector<1x4x256xf32>
    %16 = vector.shape_cast %15 : vector<1x4x256xf32> to vector<4x256xf32>
    %17 = vector.shape_cast %14 : vector<4x256xf32> to vector<1x4x256xf32>
    tpu.vector_store %arg8[%c0_15, %c0_16, %c0_17], %17 {strides = array<i32>} : memref<1x4x256xf32, #tpu.memory_space<vmem>>, vector<1x4x256xf32>,
    return
  }
  func.func @transform_0(%arg0: i32, %arg1: i32) -> (i32, i32, i32) {
    %c0_i32 = arith.constant 0 : i32
    %c0_i32_0 = arith.constant 0 : i32
    return %arg0, %c0_i32, %arg1 : i32, i32, i32
  }
  func.func @transform_1(%arg0: i32, %arg1: i32) -> (i32, i32, i32) {
    %c0_i32 = arith.constant 0 : i32
    %c0_i32_0 = arith.constant 0 : i32
    return %arg0, %c0_i32, %arg1 : i32, i32, i32
  }
  func.func @transform_2(%arg0: i32, %arg1: i32) -> (i32, i32) {
    %c0_i32 = arith.constant 0 : i32
    %c0_i32_0 = arith.constant 0 : i32
    %c0_i32_1 = arith.constant 0 : i32
    return %c0_i32, %c0_i32_0 : i32, i32
  }
  func.func @transform_3(%arg0: i32, %arg1: i32) -> (i32, i32) {
    %c0_i32 = arith.constant 0 : i32
    %c0_i32_0 = arith.constant 0 : i32
    %c0_i32_1 = arith.constant 0 : i32
    return %c0_i32, %c0_i32_0 : i32, i32
  }
  func.func @transform_4(%arg0: i32, %arg1: i32) -> (i32, i32) {
    %c0_i32 = arith.constant 0 : i32
    %c0_i32_0 = arith.constant 0 : i32
    %c0_i32_1 = arith.constant 0 : i32
    return %c0_i32, %c0_i32_0 : i32, i32
  }
  func.func @transform_5(%arg0: i32, %arg1: i32) -> (i32, i32, i32) {
    %c0_i32 = arith.constant 0 : i32
    %c0_i32_0 = arith.constant 0 : i32
    return %arg0, %c0_i32, %arg1 : i32, i32, i32
  }
  func.func @transform_6(%arg0: i32, %arg1: i32) -> (i32, i32, i32) {
    %c0_i32 = arith.constant 0 : i32
    %c0_i32_0 = arith.constant 0 : i32
    return %arg0, %c0_i32, %arg1 : i32, i32, i32
  }
}

</mosaic_0001>

<bundles_post_ra>
// kernel: fourier_residual_block_forward.4
= control target key start
LH: loop header
LB: loop body
LE: loop exit
PB: predicated region body
PF: predicated region fallthrough
CT: control target
= control target key end

     0   :  { %s549_s18 = smov 0   ;;  %s629_s0 = inlined_call_operand.vmem [shape: f32[2,8,32], index: 0, kind: input, shape index: {}]   ;;  %s630_s1 = inlined_call_operand.vmem [shape: f32[2,8,32], index: 1, kind: input, shape index: {}]   ;;  %s631_s2 = inlined_call_operand.vmem [shape: f32[4,8,32], index: 2, kind: input, shape index: {}]   ;;  %s632_s3 = inlined_call_operand.vmem [shape: f32[4,8,32], index: 3, kind: input, shape index: {}]   ;;  %s633_s4 = inlined_call_operand.vmem [shape: f32[2,4,32], index: 4, kind: output, shape index: {0}]   ;;  %s634_s5 = inlined_call_operand.vmem [shape: f32[2,4,32], index: 5, kind: output, shape index: {1}]  }
   0x1 LB: > { %s486_s19 = sadd.s32 4294967295, %s517_s18   ;;  %p490_p0 = scmp.ge.s32.totalorder %s517_s18, 1  ;;  %s517_s18 = sphi %s549_s18, %s16_s18  }
   0x2   : > { %p198_p1 = scmp.lt.s32.totalorder %s517_s18, 3 }
   0x4   : > { %p199_p2 = pnand %p490_p0, %p198_p1 }
   0x5   : > { %p232_p3 = scmp.lt.s32.totalorder (!%p199_p2), %s486_s19, 1  ;;  %v251_v0 = vld [vmem:[%s631_s2] sm:$0xff] (!%p199_p2)  ;;  %v495_v2 = vld [vmem:[%s631_s2 + $0x8] sm:$0xff] (!%p199_p2)  ;;  %vm254_vm0 = vcmask (!%p199_p2), 261120   ;;  %v497_v12 = vld [vmem:[%s631_s2 + $0x10] sm:$0xff] (!%p199_p2)  ;;  %vm378_vm1 = vcmask (!%p199_p2), 1040384  }
   0x6   : > { %202 = sbr.rel (%p199_p2) target bundleno = 55 (0x37), region = 36  ;;  %v252_v1 = vld [vmem:[%s632_s3] sm:$0xff] (!%p199_p2)  ;;  %v496_v3 = vld [vmem:[%s632_s3 + $0x8] sm:$0xff] (!%p199_p2)  ;;  %v498_v13 = vld [vmem:[%s632_s3 + $0x10] sm:$0xff] (!%p199_p2)  ;;  %vm380_vm2 = vcmask (!%p199_p2), 1041408   ;;  %vm382_vm3 = vcmask (!%p199_p2), 1042432  }
   0x7   : > { %v270_v4 = vadd.f32 (!%p199_p2), %v252_v1, %v251_v0  ;;  %v302_v7 = vadd.f32 (!%p199_p2), %v496_v3, %v495_v2  ;;  %v499_v51 = vld [vmem:[%s631_s2 + $0x18] sm:$0xff] (!%p199_p2)  ;;  %v334_v53 = vadd.f32 (!%p199_p2), %v498_v13, %v497_v12  ;;  %vm384_vm4 = vcmask (!%p199_p2), 257024  }
   0x8   : > { %v500_v54 = vld [vmem:[%s632_s3 + $0x18] sm:$0xff] (!%p199_p2) }
   0xd   : > { %s636_s19 = smov (!%p232_p3, %s486_s19), 1 }
   0xe   : > { %s491_s28 = sshll.u32 %s636_s19, 3  ;;  %s493_s20 = sshll.u32 %s636_s19, 2 }
   0xf   : > { %s235_s6 = scalar_lea.vmem %s629_s0, %s491_s28  ;;  %s239_s9 = scalar_lea.vmem %s630_s1, %s491_s28 }
  0x10   : > { %v248_v5 = vld [vmem:[%s235_s6] sm:$0xff]  ;;  %s243_s23 = scalar_lea.vmem %s633_s4, %s493_s20  ;;  %s247_s25 = scalar_lea.vmem %s634_s5, %s493_s20 }
  0x11   : > { %v578_v6 = vld [vmem:[%s239_s9] sm:$0xff]  ;;  %v253_v9 = vmul.f32 %v251_v0, %v248_v5  ;;  %v286_v11 = vmul.f32 %v495_v2, %v248_v5  ;;  %v318_v15 = vmul.f32 %v497_v12, %v248_v5  ;;  %v350_v55 = vmul.f32 %v499_v51, %v248_v5 }
  0x12   : > { %v581_v8 = vadd.f32 %v578_v6, %v248_v5  ;;  %v262_v10 = vmul.f32 %v252_v1, %v578_v6  ;;  %v294_v14 = vmul.f32 %v496_v3, %v578_v6  ;;  %v326_v16 = vmul.f32 %v498_v13, %v578_v6 }
  0x13   : > { %v255_v17 = vsel %vm254_vm0, %v253_v9, 0.0  ;;  %v287_v20 = vsel %vm254_vm0, %v286_v11, 0.0  ;;  %v319_v28 = vsel %vm254_vm0, %v318_v15, 0.0  ;;  %v366_v0 = vadd.f32 %v500_v54, %v499_v51 }
  0x14   : > { %v263_v18 = vsel %vm254_vm0, %v262_v10, 0.0  ;;  %v271_v19 = vmul.f32 %v270_v4, %v581_v8  ;;  %v256_v21 = vrot.slane %v255_v17, 4  ;;  %v288_v23 = vrot.slane %v287_v20, 4 }
  0x15   : > { %v264_v22 = vrot.slane %v263_v18, 4  ;;  %v295_v24 = vsel %vm254_vm0, %v294_v14, 0.0  ;;  %v303_v27 = vmul.f32 %v302_v7, %v581_v8  ;;  %v320_v35 = vrot.slane %v319_v28, 4 }
  0x16   : > { %v272_v25 = vsel %vm254_vm0, %v271_v19, 0.0  ;;  %v296_v26 = vrot.slane %v295_v24, 4  ;;  %v257_v29 = vadd.f32 %v256_v21, %v255_v17  ;;  %v289_v32 = vadd.f32 %v288_v23, %v287_v20 }
  0x17   : > { %v265_v30 = vadd.f32 %v264_v22, %v263_v18  ;;  %v273_v31 = vrot.slane %v272_v25, 4  ;;  %v304_v34 = vsel %vm254_vm0, %v303_v27, 0.0  ;;  %v327_v36 = vsel %vm254_vm0, %v326_v16, 0.0 }
  0x18   : > { %v297_v33 = vadd.f32 %v296_v26, %v295_v24  ;;  %v258_v37 = vrot.slane %v257_v29, 2  ;;  %v290_v40 = vrot.slane %v289_v32, 2  ;;  %v305_v42 = vrot.slane %v304_v34, 4 }
  0x19   : > { %v266_v38 = vrot.slane %v265_v30, 2  ;;  %v274_v39 = vadd.f32 %v273_v31, %v272_v25  ;;  %v321_v43 = vadd.f32 %v320_v35, %v319_v28  ;;  %v328_v44 = vrot.slane %v327_v36, 4 }
  0x1a   : > { %v298_v41 = vrot.slane %v297_v33, 2  ;;  %v259_v45 = vadd.f32 %v258_v37, %v257_v29  ;;  %v306_v49 = vadd.f32 %v305_v42, %v304_v34  ;;  %v291_v56 = vadd.f32 %v290_v40, %v289_v32 }
  0x1b   : > { %v275_v46 = vrot.slane %v274_v39, 2  ;;  %v267_v47 = vadd.f32 %v266_v38, %v265_v30  ;;  %v329_v50 = vadd.f32 %v328_v44, %v327_v36  ;;  %v322_v58 = vrot.slane %v321_v43, 2 }
  0x1c   : > { %v299_v48 = vadd.f32 %v298_v41, %v297_v33  ;;  %v307_v57 = vrot.slane %v306_v49, 2  ;;  %v260_v60 = vrot.slane %v259_v45, 1  ;;  %v335_v3 = vmul.f32 %v334_v53, %v581_v8 }
  0x1d   : > { %v276_v52 = vadd.f32 %v275_v46, %v274_v39  ;;  %v330_v59 = vrot.slane %v329_v50, 2  ;;  %v268_v61 = vrot.slane %v267_v47, 1  ;;  %v351_v4 = vsel %vm254_vm0, %v350_v55, 0.0 }
  0x1e   : > { %v300_v62 = vrot.slane %v299_v48, 1  ;;  %v308_v63 = vadd.f32 %v307_v57, %v306_v49  ;;  %v292_v7 = vrot.slane %v291_v56, 1  ;;  %v323_v10 = vadd.f32 %v322_v58, %v321_v43 }
  0x1f   : > { %v277_v1 = vrot.slane %v276_v52, 1  ;;  %v331_v2 = vadd.f32 %v330_v59, %v329_v50  ;;  %v261_v11 = vadd.f32 %v260_v60, %v259_v45  ;;  %v336_v5 = vsel %vm254_vm0, %v335_v3, 0.0 }
  0x20   : > { %v309_v9 = vrot.slane %v308_v63, 1  ;;  %v352_v12 = vrot.slane %v351_v4, 4  ;;  %v358_v13 = vmul.f32 %v500_v54, %v578_v6  ;;  %v269_v14 = vadd.f32 %v268_v61, %v267_v47 }
  0x21   : > { %v301_v15 = vadd.f32 %v300_v62, %v299_v48  ;;  %v337_v16 = vrot.slane %v336_v5, 4  ;;  %v367_v17 = vmul.f32 %v366_v0, %v581_v8  ;;  %v278_v18 = vadd.f32 %v277_v1, %v276_v52 }
  0x22   : > { %v332_v19 = vrot.slane %v331_v2, 1  ;;  %v353_v20 = vadd.f32 %v352_v12, %v351_v4  ;;  %v359_v21 = vsel %vm254_vm0, %v358_v13, 0.0  ;;  %v293_v22 = vadd.f32 %v292_v7, %v291_v56 }
  0x23   : > { %v310_v23 = vadd.f32 %v309_v9, %v308_v63  ;;  %v338_v24 = vadd.f32 %v337_v16, %v336_v5  ;;  %v360_v25 = vrot.slane %v359_v21, 4  ;;  %v324_v26 = vrot.slane %v323_v10, 1 }
  0x24   : > { %v354_v27 = vrot.slane %v353_v20, 2  ;;  %v368_v28 = vsel %vm254_vm0, %v367_v17, 0.0  ;;  %v279_v6 = vsub.f32 %v261_v11, %v269_v14  ;;  %v280_v32 = vsub.f32 %v278_v18, %v261_v11 }
  0x25   : > { %v339_v29 = vrot.slane %v338_v24, 2  ;;  %v361_v30 = vadd.f32 %v360_v25, %v359_v21  ;;  %v369_v31 = vrot.slane %v368_v28, 4  ;;  %v311_v8 = vsub.f32 %v293_v22, %v301_v15 }
  0x26   : > { %v333_v33 = vadd.f32 %v332_v19, %v331_v2  ;;  %v355_v34 = vadd.f32 %v354_v27, %v353_v20  ;;  %v312_v35 = vsub.f32 %v310_v23, %v293_v22  ;;  %v325_v39 = vadd.f32 %v324_v26, %v323_v10 }
  0x27   : > { %v340_v36 = vadd.f32 %v339_v29, %v338_v24  ;;  %v362_v37 = vrot.slane %v361_v30, 2  ;;  %v370_v38 = vadd.f32 %v369_v31, %v368_v28  ;;  %v281_v44 = vsub.f32 %v280_v32, %v269_v14 }
  0x28   : > { %v356_v41 = vrot.slane %v355_v34, 1  ;;  %v343_v45 = vsub.f32 %v325_v39, %v333_v33  ;;  %v379_v46 = vsel %vm378_vm1, %v279_v6, %v311_v8  ;;  %v313_v47 = vsub.f32 %v312_v35, %v301_v15 }
  0x29   : > { %v341_v40 = vrot.slane %v340_v36, 1  ;;  %v363_v42 = vadd.f32 %v362_v37, %v361_v30  ;;  %v371_v43 = vrot.slane %v370_v38, 2 }
  0x2a   : > { %v357_v52 = vadd.f32 %v356_v41, %v355_v34  ;;  %v381_v55 = vsel %vm380_vm2, %v379_v46, %v343_v45  ;;  %v386_v59 = vsel %vm378_vm1, %v281_v44, %v313_v47 }
  0x2b   : > { %v342_v48 = vadd.f32 %v341_v40, %v340_v36  ;;  %v364_v49 = vrot.slane %v363_v42, 1  ;;  %v372_v50 = vadd.f32 %v371_v43, %v370_v38 }
  0x2d   : > { %v344_v51 = vsub.f32 %v342_v48, %v325_v39  ;;  %v365_v53 = vadd.f32 %v364_v49, %v363_v42  ;;  %v373_v54 = vrot.slane %v372_v50, 1 }
  0x2f   : > { %v345_v56 = vsub.f32 %v344_v51, %v333_v33  ;;  %v374_v57 = vadd.f32 %v373_v54, %v372_v50  ;;  %v375_v58 = vsub.f32 %v357_v52, %v365_v53 }
  0x31   : > { %v376_v60 = vsub.f32 %v374_v57, %v357_v52  ;;  %v383_v61 = vsel %vm382_vm3, %v381_v55, %v375_v58  ;;  %v387_v62 = vsel %vm380_vm2, %v386_v59, %v345_v56 }
  0x32   : > { %385 = vst.msk [vmem:[%s243_s23] sm:$0xf] %vm384_vm4, %v383_v61 }
  0x33   : > { %v377_v63 = vsub.f32 %v376_v60, %v365_v53 }
  0x35   : > { %v388_v0 = vsel %vm382_vm3, %v387_v62, %v377_v63 }
  0x36   : > { %389 = vst.msk [vmem:[%s247_s25] sm:$0xf] %vm384_vm4, %v388_v0 }
  0x37 PF: > { %s16_s18 = sadd.s32 1, %s517_s18  }
  0x38   : > { %p13_p4 = scmp.ge.s32.totalorder %s16_s18, 4  }
  0x3a   :  { %15 = sbr.rel (!%p13_p4) target bundleno = 1 (0x1), region = 87 }

// kernel: reverse.5
= control target key start
LH: loop header
LB: loop body
LE: loop exit
PB: predicated region body
PF: predicated region fallthrough
CT: control target
= control target key end

     0   :  { %v71_v3 = vlaneseq  ;;  %v64_v9 = vld [vmem:[#allocation0 + $0x7] ss:$-1 sm:$0xff]  ;;  %v78_v12 = vld [vmem:[#allocation0 + $0x17] ss:$-1 sm:$0xff]  ;;  %s329_s0 = inlined_call_operand.vmem [shape: f32[2,4,16,7], index: 0, kind: input, shape index: {}]   ;;  %s330_s1 = inlined_call_operand.vmem [shape: f32[2,4,16,7], index: 1, kind: output, shape index: {}]  }
   0x1   :  { %v44_v0 = vld [vmem:[%s329_s0] sm:$0xff]  ;;  %v46_v1 = vld [vmem:[%s329_s0 + $0x8] sm:$0xff]  ;;  %v48_v2 = vld [vmem:[%s329_s0 + $0x10] sm:$0xff]  ;;  %v65_v10 = vrot.slane %v64_v9, 1  ;;  %v79_v14 = vrot.slane %v78_v12, 1 }
   0x2   :  { %45 = vst [vmem:[#allocation0 + $0x8] sm:$0xff] %v44_v0  ;;  %47 = vst [vmem:[#allocation0 + $0x18] sm:$0xff] %v46_v1  ;;  %v50_v4 = vld [vmem:[%s329_s0 + $0x18] sm:$0xff]  ;;  %v52_v5 = vld [vmem:[%s329_s0 + $0x20] sm:$0xff]  ;;  %v72_v11 = vshrl.u32 %v71_v3, 7 }
   0x3   :  { %49 = vst [vmem:[#allocation0 + $0x28] sm:$0xff] %v48_v2  ;;  %v54_v6 = vld [vmem:[%s329_s0 + $0x28] sm:$0xff]  ;;  %51 = vst [vmem:[#allocation0 + $0x38] sm:$0xff] %v50_v4  ;;  %v56_v7 = vld [vmem:[%s329_s0 + $0x30] sm:$0xff] }
   0x4   :  { %53 = vst [vmem:[#allocation0 + $0x48] sm:$0xff] %v52_v5  ;;  %55 = vst [vmem:[#allocation0 + $0x58] sm:$0xff] %v54_v6  ;;  %v58_v8 = vld [vmem:[%s329_s0 + $0x38] sm:$0xff]  ;;  %v92_v13 = vld [vmem:[#allocation0 + $0x27] ss:$-1 sm:$0xff]  ;;  %vm73_vm0 = vcmp.lt.s32.totalorder %v72_v11, 7 }
   0x5   :  { %57 = vst [vmem:[#allocation0 + $0x68] sm:$0xff] %v56_v7  ;;  %59 = vst [vmem:[#allocation0 + $0x78] sm:$0xff] %v58_v8  ;;  %v93_v15 = vrot.slane %v92_v13, 1  ;;  %v106_v16 = vld [vmem:[#allocation0 + $0x37] ss:$-1 sm:$0xff] }
   0x6   :  { %66 = vst [vmem:[#allocation1] sm:$0xff] %v65_v10  ;;  %v107_v17 = vrot.slane %v106_v16, 1  ;;  %v120_v18 = vld [vmem:[#allocation0 + $0x47] ss:$-1 sm:$0xff]  ;;  %v134_v19 = vld [vmem:[#allocation0 + $0x57] ss:$-1 sm:$0xff] }
   0x7   :  { %80 = vst [vmem:[#allocation1 + $0x8] sm:$0xff] %v79_v14  ;;  %94 = vst [vmem:[#allocation1 + $0x10] sm:$0xff] %v93_v15  ;;  %v121_v20 = vrot.slane %v120_v18, 1  ;;  %v135_v21 = vrot.slane %v134_v19, 1  ;;  %v148_v22 = vld [vmem:[#allocation0 + $0x67] ss:$-1 sm:$0xff] }
   0x8   :  { %v162_v23 = vld [vmem:[#allocation0 + $0x77] ss:$-1 sm:$0xff]  ;;  %108 = vst [vmem:[#allocation1 + $0x18] sm:$0xff] %v107_v17  ;;  %v149_v24 = vrot.slane %v148_v22, 1 }
   0x9   :  { %v163_v25 = vrot.slane %v162_v23, 1  ;;  %v69_v26 = vld [vmem:[#allocation0 + $0xf] ss:$-1 sm:$0xff]  ;;  %v83_v27 = vld [vmem:[#allocation0 + $0x1f] ss:$-1 sm:$0xff]  ;;  %122 = vst [vmem:[#allocation1 + $0x20] sm:$0xff] %v121_v20 }
   0xa   :  { %v97_v28 = vld [vmem:[#allocation0 + $0x2f] ss:$-1 sm:$0xff]  ;;  %136 = vst [vmem:[#allocation1 + $0x28] sm:$0xff] %v135_v21  ;;  %v70_v29 = vrot.slane %v69_v26, 1  ;;  %v84_v30 = vrot.slane %v83_v27, 1  ;;  %150 = vst [vmem:[#allocation1 + $0x30] sm:$0xff] %v149_v24 }
   0xb   :  { %v98_v31 = vrot.slane %v97_v28, 1  ;;  %v111_v32 = vld [vmem:[#allocation0 + $0x3f] ss:$-1 sm:$0xff]  ;;  %164 = vst [vmem:[#allocation1 + $0x38] sm:$0xff] %v163_v25  ;;  %v125_v34 = vld [vmem:[#allocation0 + $0x4f] ss:$-1 sm:$0xff] }
   0xc   :  { %v112_v33 = vrot.slane %v111_v32, 1  ;;  %v139_v35 = vld [vmem:[#allocation0 + $0x5f] ss:$-1 sm:$0xff]  ;;  %74 = vst.msk [vmem:[#allocation1] sm:$0xff] %vm73_vm0, %v70_v29  ;;  %88 = vst.msk [vmem:[#allocation1 + $0x8] sm:$0xff] %vm73_vm0, %v84_v30  ;;  %v126_v36 = vrot.slane %v125_v34, 1 }
   0xd   :  { %102 = vst.msk [vmem:[#allocation1 + $0x10] sm:$0xff] %vm73_vm0, %v98_v31  ;;  %v140_v37 = vrot.slane %v139_v35, 1  ;;  %v153_v38 = vld [vmem:[#allocation0 + $0x6f] ss:$-1 sm:$0xff]  ;;  %v167_v39 = vld [vmem:[#allocation0 + $0x7f] ss:$-1 sm:$0xff] }
   0xe   :  { %116 = vst.msk [vmem:[#allocation1 + $0x18] sm:$0xff] %vm73_vm0, %v112_v33  ;;  %v154_v40 = vrot.slane %v153_v38, 1  ;;  %v168_v41 = vrot.slane %v167_v39, 1  ;;  %130 = vst.msk [vmem:[#allocation1 + $0x20] sm:$0xff] %vm73_vm0, %v126_v36 }
   0xf   :  { %144 = vst.msk [vmem:[#allocation1 + $0x28] sm:$0xff] %vm73_vm0, %v140_v37 }
  0x10   :  { %158 = vst.msk [vmem:[#allocation1 + $0x30] sm:$0xff] %vm73_vm0, %v154_v40  ;;  %172 = vst.msk [vmem:[#allocation1 + $0x38] sm:$0xff] %vm73_vm0, %v168_v41 }
  0x13   :  { %v214_v42 = vld [vmem:[#allocation1] sm:$0xff]  ;;  %v216_v43 = vld [vmem:[#allocation1 + $0x8] sm:$0xff] }
  0x14   :  { %v218_v44 = vld [vmem:[#allocation1 + $0x10] sm:$0xff]  ;;  %215 = vst [vmem:[%s330_s1] sm:$0xff] %v214_v42  ;;  %217 = vst [vmem:[%s330_s1 + $0x8] sm:$0xff] %v216_v43 }
  0x15   :  { %219 = vst [vmem:[%s330_s1 + $0x10] sm:$0xff] %v218_v44  ;;  %v220_v45 = vld [vmem:[#allocation1 + $0x18] sm:$0xff]  ;;  %v222_v46 = vld [vmem:[#allocation1 + $0x20] sm:$0xff] }
  0x16   :  { %221 = vst [vmem:[%s330_s1 + $0x18] sm:$0xff] %v220_v45  ;;  %v224_v47 = vld [vmem:[#allocation1 + $0x28] sm:$0xff]  ;;  %223 = vst [vmem:[%s330_s1 + $0x20] sm:$0xff] %v222_v46 }
  0x17   :  { %225 = vst [vmem:[%s330_s1 + $0x28] sm:$0xff] %v224_v47  ;;  %v226_v48 = vld [vmem:[#allocation1 + $0x30] sm:$0xff]  ;;  %v228_v49 = vld [vmem:[#allocation1 + $0x38] sm:$0xff] }
  0x18   :  { %227 = vst [vmem:[%s330_s1 + $0x30] sm:$0xff] %v226_v48  ;;  %229 = vst [vmem:[%s330_s1 + $0x38] sm:$0xff] %v228_v49 }

// kernel: fourier_residual_block_forward.5
= control target key start
LH: loop header
LB: loop body
LE: loop exit
PB: predicated region body
PF: predicated region fallthrough
CT: control target
= control target key end

     0   :  { %s569_s15 = smov 0   ;;  %s571_s16 = smov 0   ;;  %s611_s0 = inlined_call_operand.vmem [shape: f32[2,8,256], index: 0, kind: input, shape index: {}]   ;;  %s612_s1 = inlined_call_operand.vmem [shape: f32[4,8], index: 1, kind: input, shape index: {}]   ;;  %s613_s2 = inlined_call_operand.vmem [shape: f32[4,1], index: 2, kind: input, shape index: {}]   ;;  %s614_s3 = inlined_call_operand.vmem [shape: f32[2,4,256], index: 3, kind: input, shape index: {}]   ;;  %s615_s4 = inlined_call_operand.vmem [shape: f32[2,4,256], index: 4, kind: output, shape index: {}]  }
   0x1   :  { %s573_s17 = smov 0  }
   0x2 LB: > { %s26_s18 = sadd.s32 1, %s536_s16  ;;  %p477_p0 = scmp.ge.s32.totalorder %s540_s17, 1  ;;  %s540_s17 = sphi %s573_s17, %s14_s17   ;;  %s536_s16 = sphi %s571_s16, %s617_s16   ;;  %s532_s15 = sphi %s569_s15, %s616_s15  }
   0x3   : > { %p28_p1 = scmp.ge.s32.totalorder %s26_s18, 2  ;;  %p200_p2 = scmp.lt.s32.totalorder %s540_s17, 3 }
   0x5   : > { %s619_s18 = smov (%p28_p1, %s26_s18), 0  ;;  %p201_p3 = pnand %p477_p0, %p200_p2 }
   0x6   : > { %p244_p4 = scmp.lt.s32.totalorder (!%p201_p3), %s532_s15, 1  ;;  %v542_v0 = vmov (!%p201_p3), 0.0   ;;  %v543_v1 = vmov (!%p201_p3), 0   ;;  %v276_v2 = vld [vmem:[%s613_s2] sm:$0xf] (!%p201_p3)  ;;  %vm282_vm0 = vcmask (!%p201_p3), 64512  }
   0x7   : > { %204 = sbr.rel (%p201_p3) target bundleno = 240 (0xf0), region = 36  ;;  %350 = vmatprep.mubr.f32.mxu0 (!%p201_p3), %v542_v0  ;;  %516 = vset.pattern.permute.xlu0 (!%p201_p3), %v543_v1  ;;  %v273_v5 = vld [vmem:[%s612_s1] sm:$0xf] (!%p201_p3) }
   0x8   : > { %279 = vperm.xlu0 (!%p201_p3), %516, %v276_v2  }
   0xe   : > { %s621_s15 = smov (!%p244_p4, %s532_s15), 1 }
   0xf   : > { %s487_s21 = sshll.u32 %s621_s15, 4  ;;  %s488_s27 = sshll.u32 %s621_s15, 3 }
  0x10   : > { %s251_s24 = scalar_lea.vmem %s611_s0, %s487_s21  ;;  %s261_s30 = scalar_lea.vmem %s614_s3, %s488_s27 }
  0x11   : > { %v275_v3 = vld [vmem:[%s251_s24 + $0x8] sm:$0xff]  ;;  %v274_v4 = vld [vmem:[%s251_s24] sm:$0xff]  ;;  %s271_s7 = scalar_lea.vmem %s615_s4, %s488_s27 }
  0x12   : > { %286 = vmatprep.subr.mxu0 %v275_v3  ;;  %v357_v6 = vld [vmem:[%s261_s30] sm:$0xff] }
  0x13   : > { %287 = vmatpush1.msra.mxu0 %v274_v4  ;;  %v359_v9 = vcombine.high %v357_v6, %v357_v6 }
  0x14   : > { %484 = vmatmul.mubr.msk.f32.vlgmr.msra.gmra.mrb[0].mxu0 %vm282_vm0, %v273_v5 }
  0x87   : > { %v280_v7 = vpop.permute.xlu0 %279 }
  0xe7   : > { %v352_v8 = vpop.f32.mrb[0].mxu0 }
  0xe8   : > { %v353_v10 = vadd.f32 %v352_v8, %v280_v7  ;;  %v354_v11 = vpop.f32.mrb[1].mxu0 }
  0xe9   : > { %v355_v12 = vadd.f32 %v354_v11, %v280_v7 }
  0xea   : > { %v361_v13 = vadd.f32 %v357_v6, %v353_v10 }
  0xeb   : > { %v362_v14 = vadd.f32 %v359_v9, %v355_v12 }
  0xed   : > { %v365_v15 = vcombine.low %v361_v13, %v362_v14 }
  0xef   : > { %367 = vst [vmem:[%s271_s7] sm:$0xff] %v365_v15 }
  0xf0 PF: > { %s14_s17 = sadd.s32 1, %s540_s17   ;;  %s616_s15 = smov %s536_s16 }
  0xf1   : > { %p11_p5 = scmp.ge.s32.totalorder %s14_s17, 4   ;;  %s617_s16 = smov %s619_s18 }
  0xf3   :  { %13 = sbr.rel (!%p11_p5) target bundleno = 2 (0x2), region = 69 }

// kernel: fourier_residual_block_forward.6
= control target key start
LH: loop header
LB: loop body
LE: loop exit
PB: predicated region body
PF: predicated region fallthrough
CT: control target
= control target key end

     0   :  { %s548_s18 = smov 0   ;;  %s632_s0 = inlined_call_operand.vmem [shape: f32[2,4,32], index: 0, kind: input, shape index: {}]   ;;  %s633_s1 = inlined_call_operand.vmem [shape: f32[2,4,32], index: 1, kind: input, shape index: {}]   ;;  %s634_s2 = inlined_call_operand.vmem [shape: f32[4,4,32], index: 2, kind: input, shape index: {}]   ;;  %s635_s3 = inlined_call_operand.vmem [shape: f32[4,4,32], index: 3, kind: input, shape index: {}]   ;;  %s636_s4 = inlined_call_operand.vmem [shape: f32[2,4,32], index: 4, kind: output, shape index: {0}]   ;;  %s637_s5 = inlined_call_operand.vmem [shape: f32[2,4,32], index: 5, kind: output, shape index: {1}]  }
   0x1 LB: > { %s485_s19 = sadd.s32 4294967295, %s516_s18   ;;  %p489_p0 = scmp.ge.s32.totalorder %s516_s18, 1  ;;  %s516_s18 = sphi %s548_s18, %s16_s18  }
   0x2   : > { %p198_p1 = scmp.lt.s32.totalorder %s516_s18, 3 }
   0x4   : > { %p199_p2 = pnand %p489_p0, %p198_p1 }
   0x5   : > { %p232_p3 = scmp.lt.s32.totalorder (!%p199_p2), %s485_s19, 1  ;;  %v251_v0 = vld [vmem:[%s634_s2] sm:$0xf] (!%p199_p2)  ;;  %v494_v2 = vld [vmem:[%s634_s2 + $0x4] sm:$0xf] (!%p199_p2)  ;;  %vm254_vm0 = vcmask (!%p199_p2), 257024  }
   0x6   : > { %202 = sbr.rel (%p199_p2) target bundleno = 55 (0x37), region = 36  ;;  %v252_v1 = vld [vmem:[%s635_s3] sm:$0xf] (!%p199_p2)  ;;  %v495_v3 = vld [vmem:[%s635_s3 + $0x4] sm:$0xf] (!%p199_p2)  ;;  %vm378_vm1 = vcmask (!%p199_p2), 1040384  }
   0x7   : > { %v270_v4 = vadd.f32 (!%p199_p2), %v252_v1, %v251_v0  ;;  %v302_v7 = vadd.f32 (!%p199_p2), %v495_v3, %v494_v2  ;;  %v496_v12 = vld [vmem:[%s634_s2 + $0x8] sm:$0xf] (!%p199_p2)  ;;  %v498_v51 = vld [vmem:[%s634_s2 + $0xc] sm:$0xf] (!%p199_p2)  ;;  %vm380_vm2 = vcmask (!%p199_p2), 1041408   ;;  %vm382_vm3 = vcmask (!%p199_p2), 1042432  }
   0x8   : > { %v497_v13 = vld [vmem:[%s635_s3 + $0x8] sm:$0xf] (!%p199_p2)  ;;  %v499_v54 = vld [vmem:[%s635_s3 + $0xc] sm:$0xf] (!%p199_p2) }
   0x9   : > { %v334_v53 = vadd.f32 (!%p199_p2), %v497_v13, %v496_v12 }
   0xd   : > { %s639_s19 = smov (!%p232_p3, %s485_s19), 1 }
   0xe   : > { %s568_s28 = sshll.u32 %s639_s19, 2 }
   0xf   : > { %s235_s6 = scalar_lea.vmem %s632_s0, %s568_s28  ;;  %s239_s9 = scalar_lea.vmem %s633_s1, %s568_s28 }
  0x10   : > { %v248_v5 = vld [vmem:[%s235_s6] sm:$0xf]  ;;  %s243_s21 = scalar_lea.vmem %s636_s4, %s568_s28  ;;  %s247_s24 = scalar_lea.vmem %s637_s5, %s568_s28 }
  0x11   : > { %v578_v6 = vld [vmem:[%s239_s9] sm:$0xf]  ;;  %v253_v9 = vmul.f32 %v251_v0, %v248_v5  ;;  %v286_v11 = vmul.f32 %v494_v2, %v248_v5  ;;  %v318_v15 = vmul.f32 %v496_v12, %v248_v5  ;;  %v350_v55 = vmul.f32 %v498_v51, %v248_v5 }
  0x12   : > { %v581_v8 = vadd.f32 %v578_v6, %v248_v5  ;;  %v262_v10 = vmul.f32 %v252_v1, %v578_v6  ;;  %v294_v14 = vmul.f32 %v495_v3, %v578_v6  ;;  %v326_v16 = vmul.f32 %v497_v13, %v578_v6 }
  0x13   : > { %v255_v17 = vsel %vm254_vm0, %v253_v9, 0.0  ;;  %v287_v20 = vsel %vm254_vm0, %v286_v11, 0.0  ;;  %v319_v28 = vsel %vm254_vm0, %v318_v15, 0.0  ;;  %v366_v0 = vadd.f32 %v499_v54, %v498_v51 }
  0x14   : > { %v263_v18 = vsel %vm254_vm0, %v262_v10, 0.0  ;;  %v271_v19 = vmul.f32 %v270_v4, %v581_v8  ;;  %v256_v21 = vrot.slane %v255_v17, 4  ;;  %v288_v23 = vrot.slane %v287_v20, 4 }
  0x15   : > { %v264_v22 = vrot.slane %v263_v18, 4  ;;  %v295_v24 = vsel %vm254_vm0, %v294_v14, 0.0  ;;  %v303_v27 = vmul.f32 %v302_v7, %v581_v8  ;;  %v320_v35 = vrot.slane %v319_v28, 4 }
  0x16   : > { %v272_v25 = vsel %vm254_vm0, %v271_v19, 0.0  ;;  %v296_v26 = vrot.slane %v295_v24, 4  ;;  %v257_v29 = vadd.f32 %v256_v21, %v255_v17  ;;  %v289_v32 = vadd.f32 %v288_v23, %v287_v20 }
  0x17   : > { %v265_v30 = vadd.f32 %v264_v22, %v263_v18  ;;  %v273_v31 = vrot.slane %v272_v25, 4  ;;  %v304_v34 = vsel %vm254_vm0, %v303_v27, 0.0  ;;  %v327_v36 = vsel %vm254_vm0, %v326_v16, 0.0 }
  0x18   : > { %v297_v33 = vadd.f32 %v296_v26, %v295_v24  ;;  %v258_v37 = vrot.slane %v257_v29, 2  ;;  %v290_v40 = vrot.slane %v289_v32, 2  ;;  %v305_v42 = vrot.slane %v304_v34, 4 }
  0x19   : > { %v266_v38 = vrot.slane %v265_v30, 2  ;;  %v274_v39 = vadd.f32 %v273_v31, %v272_v25  ;;  %v321_v43 = vadd.f32 %v320_v35, %v319_v28  ;;  %v328_v44 = vrot.slane %v327_v36, 4 }
  0x1a   : > { %v298_v41 = vrot.slane %v297_v33, 2  ;;  %v259_v45 = vadd.f32 %v258_v37, %v257_v29  ;;  %v306_v49 = vadd.f32 %v305_v42, %v304_v34  ;;  %v291_v56 = vadd.f32 %v290_v40, %v289_v32 }
  0x1b   : > { %v275_v46 = vrot.slane %v274_v39, 2  ;;  %v267_v47 = vadd.f32 %v266_v38, %v265_v30  ;;  %v329_v50 = vadd.f32 %v328_v44, %v327_v36  ;;  %v322_v58 = vrot.slane %v321_v43, 2 }
  0x1c   : > { %v299_v48 = vadd.f32 %v298_v41, %v297_v33  ;;  %v307_v57 = vrot.slane %v306_v49, 2  ;;  %v260_v60 = vrot.slane %v259_v45, 1  ;;  %v335_v3 = vmul.f32 %v334_v53, %v581_v8 }
  0x1d   : > { %v276_v52 = vadd.f32 %v275_v46, %v274_v39  ;;  %v330_v59 = vrot.slane %v329_v50, 2  ;;  %v268_v61 = vrot.slane %v267_v47, 1  ;;  %v351_v4 = vsel %vm254_vm0, %v350_v55, 0.0 }
  0x1e   : > { %v300_v62 = vrot.slane %v299_v48, 1  ;;  %v308_v63 = vadd.f32 %v307_v57, %v306_v49  ;;  %v292_v7 = vrot.slane %v291_v56, 1  ;;  %v323_v10 = vadd.f32 %v322_v58, %v321_v43 }
  0x1f   : > { %v277_v1 = vrot.slane %v276_v52, 1  ;;  %v331_v2 = vadd.f32 %v330_v59, %v329_v50  ;;  %v261_v11 = vadd.f32 %v260_v60, %v259_v45  ;;  %v336_v5 = vsel %vm254_vm0, %v335_v3, 0.0 }
  0x20   : > { %v309_v9 = vrot.slane %v308_v63, 1  ;;  %v352_v12 = vrot.slane %v351_v4, 4  ;;  %v358_v13 = vmul.f32 %v499_v54, %v578_v6  ;;  %v269_v14 = vadd.f32 %v268_v61, %v267_v47 }
  0x21   : > { %v301_v15 = vadd.f32 %v300_v62, %v299_v48  ;;  %v337_v16 = vrot.slane %v336_v5, 4  ;;  %v367_v17 = vmul.f32 %v366_v0, %v581_v8  ;;  %v278_v18 = vadd.f32 %v277_v1, %v276_v52 }
  0x22   : > { %v332_v19 = vrot.slane %v331_v2, 1  ;;  %v353_v20 = vadd.f32 %v352_v12, %v351_v4  ;;  %v359_v21 = vsel %vm254_vm0, %v358_v13, 0.0  ;;  %v293_v22 = vadd.f32 %v292_v7, %v291_v56 }
  0x23   : > { %v310_v23 = vadd.f32 %v309_v9, %v308_v63  ;;  %v338_v24 = vadd.f32 %v337_v16, %v336_v5  ;;  %v360_v25 = vrot.slane %v359_v21, 4  ;;  %v324_v26 = vrot.slane %v323_v10, 1 }
  0x24   : > { %v354_v27 = vrot.slane %v353_v20, 2  ;;  %v368_v28 = vsel %vm254_vm0, %v367_v17, 0.0  ;;  %v279_v6 = vsub.f32 %v261_v11, %v269_v14  ;;  %v280_v32 = vsub.f32 %v278_v18, %v261_v11 }
  0x25   : > { %v339_v29 = vrot.slane %v338_v24, 2  ;;  %v361_v30 = vadd.f32 %v360_v25, %v359_v21  ;;  %v369_v31 = vrot.slane %v368_v28, 4  ;;  %v311_v8 = vsub.f32 %v293_v22, %v301_v15 }
  0x26   : > { %v333_v33 = vadd.f32 %v332_v19, %v331_v2  ;;  %v355_v34 = vadd.f32 %v354_v27, %v353_v20  ;;  %v312_v35 = vsub.f32 %v310_v23, %v293_v22  ;;  %v325_v39 = vadd.f32 %v324_v26, %v323_v10 }
  0x27   : > { %v340_v36 = vadd.f32 %v339_v29, %v338_v24  ;;  %v362_v37 = vrot.slane %v361_v30, 2  ;;  %v370_v38 = vadd.f32 %v369_v31, %v368_v28  ;;  %v281_v44 = vsub.f32 %v280_v32, %v269_v14 }
  0x28   : > { %v356_v41 = vrot.slane %v355_v34, 1  ;;  %v343_v45 = vsub.f32 %v325_v39, %v333_v33  ;;  %v379_v46 = vsel %vm378_vm1, %v279_v6, %v311_v8  ;;  %v313_v47 = vsub.f32 %v312_v35, %v301_v15 }
  0x29   : > { %v341_v40 = vrot.slane %v340_v36, 1  ;;  %v363_v42 = vadd.f32 %v362_v37, %v361_v30  ;;  %v371_v43 = vrot.slane %v370_v38, 2 }
  0x2a   : > { %v357_v52 = vadd.f32 %v356_v41, %v355_v34  ;;  %v381_v55 = vsel %vm380_vm2, %v379_v46, %v343_v45  ;;  %v385_v59 = vsel %vm378_vm1, %v281_v44, %v313_v47 }
  0x2b   : > { %v342_v48 = vadd.f32 %v341_v40, %v340_v36  ;;  %v364_v49 = vrot.slane %v363_v42, 1  ;;  %v372_v50 = vadd.f32 %v371_v43, %v370_v38 }
  0x2d   : > { %v344_v51 = vsub.f32 %v342_v48, %v325_v39  ;;  %v365_v53 = vadd.f32 %v364_v49, %v363_v42  ;;  %v373_v54 = vrot.slane %v372_v50, 1 }
  0x2f   : > { %v345_v56 = vsub.f32 %v344_v51, %v333_v33  ;;  %v374_v57 = vadd.f32 %v373_v54, %v372_v50  ;;  %v375_v58 = vsub.f32 %v357_v52, %v365_v53 }
  0x31   : > { %v376_v60 = vsub.f32 %v374_v57, %v357_v52  ;;  %v383_v61 = vsel %vm382_vm3, %v381_v55, %v375_v58  ;;  %v386_v62 = vsel %vm380_vm2, %v385_v59, %v345_v56 }
  0x32   : > { %384 = vst.msk [vmem:[%s243_s21] sm:$0xf] %vm254_vm0, %v383_v61 }
  0x33   : > { %v377_v63 = vsub.f32 %v376_v60, %v365_v53 }
  0x35   : > { %v387_v0 = vsel %vm382_vm3, %v386_v62, %v377_v63 }
  0x36   : > { %388 = vst.msk [vmem:[%s247_s24] sm:$0xf] %vm254_vm0, %v387_v0 }
  0x37 PF: > { %s16_s18 = sadd.s32 1, %s516_s18  }
  0x38   : > { %p13_p4 = scmp.ge.s32.totalorder %s16_s18, 4  }
  0x3a   :  { %15 = sbr.rel (!%p13_p4) target bundleno = 1 (0x1), region = 87 }

// kernel: fourier_residual_block_forward.7
= control target key start
LH: loop header
LB: loop body
LE: loop exit
PB: predicated region body
PF: predicated region fallthrough
CT: control target
= control target key end

     0   :  { %s782_s21 = smov 0   ;;  %s784_s22 = smov 0   ;;  %s835_s0 = inlined_call_operand.vmem [shape: f32[2,4,256], index: 0, kind: input, shape index: {}]   ;;  %s836_s1 = inlined_call_operand.vmem [shape: f32[2,8,256], index: 1, kind: input, shape index: {}]   ;;  %s837_s2 = inlined_call_operand.vmem [shape: f32[4,4], index: 2, kind: input, shape index: {}]   ;;  %s838_s3 = inlined_call_operand.vmem [shape: f32[4,8], index: 3, kind: input, shape index: {}]   ;;  %s839_s4 = inlined_call_operand.vmem [shape: f32[4,1], index: 4, kind: input, shape index: {}]   ;;  %s840_s5 = inlined_call_operand.vmem [shape: f32[2,4,256], index: 5, kind: input, shape index: {}]   ;;  %s841_s6 = inlined_call_operand.vmem [shape: f32[2,4,256], index: 6, kind: output, shape index: {}]  }
   0x1   :  { %s786_s23 = smov 0  }
   0x2 LB: > { %s28_s24 = sadd.s32 1, %s739_s22  ;;  %p671_p0 = scmp.ge.s32.totalorder %s743_s23, 1  ;;  %s743_s23 = sphi %s786_s23, %s16_s23   ;;  %s739_s22 = sphi %s784_s22, %s843_s22   ;;  %s735_s21 = sphi %s782_s21, %s842_s21  }
   0x3   : > { %p30_p1 = scmp.ge.s32.totalorder %s28_s24, 2  ;;  %p267_p2 = scmp.lt.s32.totalorder %s743_s23, 3 }
   0x5   : > { %s845_s24 = smov (%p30_p1, %s28_s24), 0  ;;  %p268_p3 = pnand %p671_p0, %p267_p2 }
   0x6   : > { %p324_p4 = scmp.lt.s32.totalorder (!%p268_p3), %s735_s21, 1  ;;  %v745_v0 = vmov (!%p268_p3), 0.0   ;;  %v525_v1 = vld [vmem:[%s839_s4] sm:$0xf] (!%p268_p3)  ;;  %v746_v2 = vmov (!%p268_p3), 0   ;;  %vm449_vm0 = vcmask (!%p268_p3), 1043456  }
   0x7   : > { %271 = sbr.rel (%p268_p3) target bundleno = 245 (0xf5), region = 44  ;;  %436 = vmatprep.mubr.f32.mxu1 (!%p268_p3), %v745_v0  ;;  %518 = vmatprep.mubr.f32.mxu0 (!%p268_p3), %v745_v0  ;;  %v365_v3 = vld [vmem:[%s838_s3] sm:$0xf] (!%p268_p3)  ;;  %vm368_vm1 = vcmask (!%p268_p3), 64512   ;;  %vm445_vm2 = vcmask (!%p268_p3), 31744  }
   0x8   : > { %718 = vset.pattern.permute.xlu0 (!%p268_p3), %v746_v2  ;;  %v363_v8 = vld [vmem:[%s837_s2] sm:$0xf] (!%p268_p3) }
   0x9   : > { %528 = vperm.xlu0 (!%p268_p3), %718, %v525_v1  }
   0xe   : > { %s847_s21 = smov (!%p324_p4, %s735_s21), 1 }
   0xf   : > { %s687_s27 = sshll.u32 %s847_s21, 4  ;;  %s803_s28 = sshll.u32 %s847_s21, 3 }
  0x10   : > { %s341_s7 = scalar_lea.vmem %s836_s1, %s687_s27  ;;  %s331_s10 = scalar_lea.vmem %s835_s0, %s803_s28 }
  0x11   : > { %v367_v4 = vld [vmem:[%s341_s7 + $0x8] sm:$0xff]  ;;  %v366_v5 = vld [vmem:[%s341_s7] sm:$0xff]  ;;  %s351_s17 = scalar_lea.vmem %s840_s5, %s803_s28  ;;  %s361_s20 = scalar_lea.vmem %s841_s6, %s803_s28 }
  0x12   : > { %v364_v6 = vld [vmem:[%s331_s10] sm:$0xff]  ;;  %372 = vmatprep.subr.mxu1 %v367_v4 }
  0x13   : > { %v444_v7 = vcombine.high %v364_v6, %v364_v6  ;;  %373 = vmatpush1.msra.mxu1 %v366_v5  ;;  %v533_v11 = vld [vmem:[%s351_s17] sm:$0xff] }
  0x14   : > { %680 = vmatmul.mubr.msk.f32.vlgmr.msra.gmra.mrb[0].mxu1 %vm368_vm1, %v365_v3  ;;  %v535_v17 = vcombine.high %v533_v11, %v533_v11 }
  0x15   : > { %681 = vmatprep.subr.msk.mxu0 %vm449_vm0, %v444_v7 }
  0x16   : > { %682 = vmatpush1.msk.msra.mxu0 %vm449_vm0, %v364_v6 }
  0x17   : > { %683 = vmatmul.mubr.msk.f32.vlgmr.msra.gmra.mrb[0].mxu0 %vm445_vm2, %v363_v8 }
  0x88   : > { %v529_v13 = vpop.permute.xlu0 %528 }
  0xe7   : > { %v438_v9 = vpop.f32.mrb[0].mxu1 }
  0xe8   : > { %v440_v10 = vpop.f32.mrb[1].mxu1 }
  0xea   : > { %v520_v12 = vpop.f32.mrb[0].mxu0 }
  0xeb   : > { %v521_v14 = vadd.f32 %v520_v12, %v438_v9  ;;  %v522_v15 = vpop.f32.mrb[1].mxu0 }
  0xec   : > { %v523_v16 = vadd.f32 %v522_v15, %v440_v10 }
  0xed   : > { %v531_v18 = vadd.f32 %v529_v13, %v521_v14 }
  0xee   : > { %v532_v19 = vadd.f32 %v529_v13, %v523_v16 }
  0xef   : > { %v537_v20 = vadd.f32 %v533_v11, %v531_v18 }
  0xf0   : > { %v538_v21 = vadd.f32 %v535_v17, %v532_v19 }
  0xf2   : > { %v541_v22 = vcombine.low %v537_v20, %v538_v21 }
  0xf4   : > { %543 = vst [vmem:[%s361_s20] sm:$0xff] %v541_v22 }
  0xf5 PF: > { %s16_s23 = sadd.s32 1, %s743_s23   ;;  %s842_s21 = smov %s739_s22 }
  0xf6   : > { %p13_p5 = scmp.ge.s32.totalorder %s16_s23, 4   ;;  %s843_s22 = smov %s845_s24 }
  0xf8   :  { %15 = sbr.rel (!%p13_p5) target bundleno = 2 (0x2), region = 80 }

</bundles_post_ra>
